<compile_context>
chip_gen: v6e
topology: v6e:2x2x1
jax: 0.10.0
libtpu: 0.0.40
codegen_flags: <defaults>
</compile_context>

<pallas_src>
import functools

import jax
import jax.numpy as jnp
from jax.experimental import pallas as pl
from jax.experimental.pallas import tpu as pltpu

CODE_LENGTH = 20
LAYER_DIMS = [784, 256, 64, CODE_LENGTH, 64, 256, 784]  # 6 linear layers


def ae_kernel(x_ref,
              w1_ref, b1_ref, w2_ref, b2_ref, w3_ref, b3_ref,
              w4_ref, b4_ref, w5_ref, b5_ref, w6_ref, b6_ref,
              o_ref):
    """Full autoencoder forward for one VMEM-resident batch tile."""

    def linear(h, w_ref, b_ref):
        # bf16 MXU operands, f32 accumulation, f32 bias add (VPU).
        acc = jnp.dot(h.astype(jnp.bfloat16), w_ref[...],
                      preferred_element_type=jnp.float32)
        return acc + b_ref[...]

    h = x_ref[...]
    # Encoder: Linear+ReLU x3
    h = jnp.maximum(linear(h, w1_ref, b1_ref), 0.0)
    h = jnp.maximum(linear(h, w2_ref, b2_ref), 0.0)
    h = jnp.maximum(linear(h, w3_ref, b3_ref), 0.0)
    # Decoder: Linear+ReLU x2, Linear+Sigmoid
    h = jnp.maximum(linear(h, w4_ref, b4_ref), 0.0)
    h = jnp.maximum(linear(h, w5_ref, b5_ref), 0.0)
    logits = linear(h, w6_ref, b6_ref)

    # sigmoid(x) == 0.5 * tanh(0.5*x) + 0.5  (single EUP transcendental,
    # result guaranteed inside [0, 1]).
    y = 0.5 * jnp.tanh(0.5 * logits) + 0.5
    o_ref[...] = y.astype(o_ref.dtype)


def _round_up(n, m):
    return ((n + m - 1) // m) * m


def _choose_tile(b, tile_b):
    """Batch-tile selection.

    * b <= 128: one tile, rounded to the sublane multiple (8).
    * b  > 128: tiles are multiples of 128 (lane/MXU friendly) and sized so
      the grid has at least 2 steps (v7x: both TensorCores get work), capped
      at `tile_b` (1024 default ~= HBM-roofline sweet spot).
    """
    if b <= 128:
        return max(8, _round_up(b, 8))
    half = _round_up((b + 1) // 2, 128)
    return int(min(tile_b, half))


@functools.partial(jax.jit, static_argnames=("tile",))
def _ae_forward_impl(x2d, flat_params, tile):
    b = x2d.shape[0]
    padded_b = _round_up(b, tile)
    if padded_b != b:
        x2d = jnp.pad(x2d, ((0, padded_b - b), (0, 0)))
    grid = (padded_b // tile,)

    x_spec = pl.BlockSpec((tile, 784), lambda i: (i, 0))
    out_spec = pl.BlockSpec((tile, 784), lambda i: (i, 0))
    # Weights/biases: full-shape blocks, constant block index -> fetched once
    # and VMEM-resident across all batch tiles; single-buffered (double
    # buffering a constant-index block only wastes VMEM).
    param_specs = [
        pl.BlockSpec(p.shape, lambda i: (0, 0), pipeline_mode=pl.Buffered(1))
        for p in flat_params
    ]

    flops = 2 * padded_b * sum(LAYER_DIMS[i] * LAYER_DIMS[i + 1]
                               for i in range(len(LAYER_DIMS) - 1))
    weight_bytes = sum(int(p.size) * p.dtype.itemsize for p in flat_params)
    io_itemsize = x2d.dtype.itemsize
    bytes_accessed = weight_bytes + padded_b * 784 * io_itemsize * 2  # x + out
    cost = pl.CostEstimate(flops=flops,
                           transcendentals=padded_b * 784,   # one tanh/elem
                           bytes_accessed=bytes_accessed)

    # VMEM budget sized to the tile: at tile=1024 the double-buffered f32
    # x/out tiles are ~12.5 MiB plus params + f32 intermediates -> 32 MiB
    # (still well under v7x's 64 MiB per TensorCore).
    vmem_limit = (32 << 20) if tile >= 512 else (16 << 20)

    out = pl.pallas_call(
        ae_kernel,
        out_shape=jax.ShapeDtypeStruct((padded_b, 784), x2d.dtype),
        grid=grid,
        in_specs=[x_spec] + param_specs,
        out_specs=out_spec,
        compiler_params=pltpu.CompilerParams(
            dimension_semantics=("parallel",),   # shard batch across TCs (v7x)
            vmem_limit_bytes=vmem_limit),
        cost_estimate=cost,
    )(x2d, *flat_params)
    return out[:b]


def ae_forward(x, params, tile_b=1024):
    """x: [b, 1, 28, 28] (f32 or bf16) -> [b, 1, 28, 28] same dtype."""
    b = x.shape[0]
    x2d = x.reshape(b, 784)
    flat_params = []
    for (w, bias) in params:
        flat_params.append(w)
        flat_params.append(bias)
    tile = _choose_tile(b, tile_b)
    out = _ae_forward_impl(x2d, tuple(flat_params), tile)
    return out.reshape(b, 1, 28, 28)


def init_params(key):
    """Synthetic weights matching nn.Linear shapes.

    PyTorch stores W as (out, in); we keep (in, out) so the kernel does x @ W.
    Weights live in bf16 (half the HBM weight traffic, native MXU operand);
    biases stay f32 for the f32 VPU bias add.
    """
    params = []
    for i in range(len(LAYER_DIMS) - 1):
        fan_in, fan_out = LAYER_DIMS[i], LAYER_DIMS[i + 1]
        key, wkey, bkey = jax.random.split(key, 3)
        bound = 1.0 / jnp.sqrt(fan_in)
        w = jax.random.uniform(wkey, (fan_in, fan_out), jnp.float32, -bound, bound)
        bias = jax.random.uniform(bkey, (1, fan_out), jnp.float32, -bound, bound)
        params.append((w.astype(jnp.bfloat16), bias))
    return params


def _ref_forward(x, params):
    """Pure-JAX reference doing the same bf16-matmul / f32-accumulate math."""
    h = x.reshape(x.shape[0], 784)
    for i, (w, b) in enumerate(params):
        h = jnp.dot(h.astype(jnp.bfloat16), w,
                    preferred_element_type=jnp.float32) + b
        h = jax.nn.sigmoid(h) if i == len(params) - 1 else jnp.maximum(h, 0.0)
    return h.reshape(-1, 1, 28, 28)


if __name__ == "__main__":
    key = jax.random.PRNGKey(0)
    key, xkey1, xkey2 = jax.random.split(key, 3)
    params = init_params(key)

    # Small batch: single-tile path.
    batch = 8
    x = jax.random.uniform(xkey1, (batch, 1, 28, 28), jnp.float32)
    y = ae_forward(x, params)
    jax.block_until_ready(y)

    assert y.shape == (batch, 1, 28, 28), y.shape
    assert y.dtype == jnp.float32
    assert bool(jnp.all((y >= 0.0) & (y <= 1.0)))
    y_ref = _ref_forward(x, params)
    assert bool(jnp.allclose(y, y_ref, atol=5e-3, rtol=5e-3)), \
        float(jnp.max(jnp.abs(y - y_ref)))

    # Larger batch: exercises padding + the >=2-step (128-wide) tiled grid.
    batch2 = 200
    x2 = jax.random.uniform(xkey2, (batch2, 1, 28, 28), jnp.float32)
    y2 = ae_forward(x2, params)
    jax.block_until_ready(y2)

    assert y2.shape == (batch2, 1, 28, 28), y2.shape
    assert bool(jnp.all((y2 >= 0.0) & (y2 <= 1.0)))
    y2_ref = _ref_forward(x2, params)
    assert bool(jnp.allclose(y2, y2_ref, atol=5e-3, rtol=5e-3)), \
        float(jnp.max(jnp.abs(y2 - y2_ref)))

    print("KERNEL_OK")
</pallas_src>

<mosaic_0001>
module attributes {stable_mosaic.version = 11 : i64} {
  func.func @ae_kernel(%arg0: i32, %arg1: memref<8x784xf32, #tpu.memory_space<vmem>>, %arg2: memref<784x256xbf16, #tpu.memory_space<vmem>>, %arg3: memref<1x256xf32, #tpu.memory_space<vmem>>, %arg4: memref<256x64xbf16, #tpu.memory_space<vmem>>, %arg5: memref<1x64xf32, #tpu.memory_space<vmem>>, %arg6: memref<64x20xbf16, #tpu.memory_space<vmem>>, %arg7: memref<1x20xf32, #tpu.memory_space<vmem>>, %arg8: memref<20x64xbf16, #tpu.memory_space<vmem>>, %arg9: memref<1x64xf32, #tpu.memory_space<vmem>>, %arg10: memref<64x256xbf16, #tpu.memory_space<vmem>>, %arg11: memref<1x256xf32, #tpu.memory_space<vmem>>, %arg12: memref<256x784xbf16, #tpu.memory_space<vmem>>, %arg13: memref<1x784xf32, #tpu.memory_space<vmem>>, %arg14: memref<8x784xf32, #tpu.memory_space<vmem>>) attributes {dimension_semantics = [#tpu.dimension_semantics<parallel>], iteration_bounds = array<i64: 1>, scalar_prefetch = 0 : i64, scratch_operands = 0 : i64, tpu.core_type = #tpu.core_type<tc>, window_params = [{transform_indices = @transform_0, window_bounds = array<i64: 8, 784>}, {pipeline_mode = #tpu.pipeline_mode<synchronous>, transform_indices = @transform_1, window_bounds = array<i64: 784, 256>}, {pipeline_mode = #tpu.pipeline_mode<synchronous>, transform_indices = @transform_2, window_bounds = array<i64: 1, 256>}, {pipeline_mode = #tpu.pipeline_mode<synchronous>, transform_indices = @transform_3, window_bounds = array<i64: 256, 64>}, {pipeline_mode = #tpu.pipeline_mode<synchronous>, transform_indices = @transform_4, window_bounds = array<i64: 1, 64>}, {pipeline_mode = #tpu.pipeline_mode<synchronous>, transform_indices = @transform_5, window_bounds = array<i64: 64, 20>}, {pipeline_mode = #tpu.pipeline_mode<synchronous>, transform_indices = @transform_6, window_bounds = array<i64: 1, 20>}, {pipeline_mode = #tpu.pipeline_mode<synchronous>, transform_indices = @transform_7, window_bounds = array<i64: 20, 64>}, {pipeline_mode = #tpu.pipeline_mode<synchronous>, transform_indices = @transform_8, window_bounds = array<i64: 1, 64>}, {pipeline_mode = #tpu.pipeline_mode<synchronous>, transform_indices = @transform_9, window_bounds = array<i64: 64, 256>}, {pipeline_mode = #tpu.pipeline_mode<synchronous>, transform_indices = @transform_10, window_bounds = array<i64: 1, 256>}, {pipeline_mode = #tpu.pipeline_mode<synchronous>, transform_indices = @transform_11, window_bounds = array<i64: 256, 784>}, {pipeline_mode = #tpu.pipeline_mode<synchronous>, transform_indices = @transform_12, window_bounds = array<i64: 1, 784>}, {transform_indices = @transform_13, window_bounds = array<i64: 8, 784>}]} {
    %c0 = arith.constant 0 : index
    %c0_0 = arith.constant 0 : index
    %0 = vector.load %arg1[%c0, %c0_0] : memref<8x784xf32, #tpu.memory_space<vmem>>, vector<8x784xf32>
    %1 = arith.truncf %0 : vector<8x784xf32> to vector<8x784xbf16>
    %c0_1 = arith.constant 0 : index
    %c0_2 = arith.constant 0 : index
    %2 = vector.load %arg2[%c0_1, %c0_2] : memref<784x256xbf16, #tpu.memory_space<vmem>>, vector<784x256xbf16>
    %cst = arith.constant dense<0.000000e+00> : vector<8x256xf32>
    %3 = tpu.matmul %1, %2, %cst {dimension_numbers = #tpu.dot_dimension_numbers<[1], [0], [0], [1], [0, 0, 1, 1], [], []>} : vector<8x784xbf16>, vector<784x256xbf16>, vector<8x256xf32> -> vector<8x256xf32>
    %c0_3 = arith.constant 0 : index
    %c0_4 = arith.constant 0 : index
    %4 = vector.load %arg3[%c0_3, %c0_4] : memref<1x256xf32, #tpu.memory_space<vmem>>, vector<1x256xf32>
    %5 = vector.broadcast %4 : vector<1x256xf32> to vector<8x256xf32>
    %6 = arith.addf %3, %5 : vector<8x256xf32>
    %cst_5 = arith.constant 0.000000e+00 : f32
    %7 = vector.broadcast %cst_5 : f32 to vector<8x256xf32>
    %8 = arith.maximumf %6, %7 : vector<8x256xf32>
    %9 = arith.truncf %8 : vector<8x256xf32> to vector<8x256xbf16>
    %c0_6 = arith.constant 0 : index
    %c0_7 = arith.constant 0 : index
    %10 = vector.load %arg4[%c0_6, %c0_7] : memref<256x64xbf16, #tpu.memory_space<vmem>>, vector<256x64xbf16>
    %cst_8 = arith.constant dense<0.000000e+00> : vector<8x64xf32>
    %11 = tpu.matmul %9, %10, %cst_8 {dimension_numbers = #tpu.dot_dimension_numbers<[1], [0], [0], [1], [0, 0, 1, 1], [], []>} : vector<8x256xbf16>, vector<256x64xbf16>, vector<8x64xf32> -> vector<8x64xf32>
    %c0_9 = arith.constant 0 : index
    %c0_10 = arith.constant 0 : index
    %12 = vector.load %arg5[%c0_9, %c0_10] : memref<1x64xf32, #tpu.memory_space<vmem>>, vector<1x64xf32>
    %13 = vector.broadcast %12 : vector<1x64xf32> to vector<8x64xf32>
    %14 = arith.addf %11, %13 : vector<8x64xf32>
    %cst_11 = arith.constant 0.000000e+00 : f32
    %15 = vector.broadcast %cst_11 : f32 to vector<8x64xf32>
    %16 = arith.maximumf %14, %15 : vector<8x64xf32>
    %17 = arith.truncf %16 : vector<8x64xf32> to vector<8x64xbf16>
    %c0_12 = arith.constant 0 : index
    %c0_13 = arith.constant 0 : index
    %18 = vector.load %arg6[%c0_12, %c0_13] : memref<64x20xbf16, #tpu.memory_space<vmem>>, vector<64x20xbf16>
    %cst_14 = arith.constant dense<0.000000e+00> : vector<8x20xf32>
    %19 = tpu.matmul %17, %18, %cst_14 {dimension_numbers = #tpu.dot_dimension_numbers<[1], [0], [0], [1], [0, 0, 1, 1], [], []>} : vector<8x64xbf16>, vector<64x20xbf16>, vector<8x20xf32> -> vector<8x20xf32>
    %c0_15 = arith.constant 0 : index
    %c0_16 = arith.constant 0 : index
    %20 = vector.load %arg7[%c0_15, %c0_16] : memref<1x20xf32, #tpu.memory_space<vmem>>, vector<1x20xf32>
    %21 = vector.broadcast %20 : vector<1x20xf32> to vector<8x20xf32>
    %22 = arith.addf %19, %21 : vector<8x20xf32>
    %cst_17 = arith.constant 0.000000e+00 : f32
    %23 = vector.broadcast %cst_17 : f32 to vector<8x20xf32>
    %24 = arith.maximumf %22, %23 : vector<8x20xf32>
    %25 = arith.truncf %24 : vector<8x20xf32> to vector<8x20xbf16>
    %c0_18 = arith.constant 0 : index
    %c0_19 = arith.constant 0 : index
    %26 = vector.load %arg8[%c0_18, %c0_19] : memref<20x64xbf16, #tpu.memory_space<vmem>>, vector<20x64xbf16>
    %cst_20 = arith.constant dense<0.000000e+00> : vector<8x64xf32>
    %27 = tpu.matmul %25, %26, %cst_20 {dimension_numbers = #tpu.dot_dimension_numbers<[1], [0], [0], [1], [0, 0, 1, 1], [], []>} : vector<8x20xbf16>, vector<20x64xbf16>, vector<8x64xf32> -> vector<8x64xf32>
    %c0_21 = arith.constant 0 : index
    %c0_22 = arith.constant 0 : index
    %28 = vector.load %arg9[%c0_21, %c0_22] : memref<1x64xf32, #tpu.memory_space<vmem>>, vector<1x64xf32>
    %29 = vector.broadcast %28 : vector<1x64xf32> to vector<8x64xf32>
    %30 = arith.addf %27, %29 : vector<8x64xf32>
    %cst_23 = arith.constant 0.000000e+00 : f32
    %31 = vector.broadcast %cst_23 : f32 to vector<8x64xf32>
    %32 = arith.maximumf %30, %31 : vector<8x64xf32>
    %33 = arith.truncf %32 : vector<8x64xf32> to vector<8x64xbf16>
    %c0_24 = arith.constant 0 : index
    %c0_25 = arith.constant 0 : index
    %34 = vector.load %arg10[%c0_24, %c0_25] : memref<64x256xbf16, #tpu.memory_space<vmem>>, vector<64x256xbf16>
    %cst_26 = arith.constant dense<0.000000e+00> : vector<8x256xf32>
    %35 = tpu.matmul %33, %34, %cst_26 {dimension_numbers = #tpu.dot_dimension_numbers<[1], [0], [0], [1], [0, 0, 1, 1], [], []>} : vector<8x64xbf16>, vector<64x256xbf16>, vector<8x256xf32> -> vector<8x256xf32>
    %c0_27 = arith.constant 0 : index
    %c0_28 = arith.constant 0 : index
    %36 = vector.load %arg11[%c0_27, %c0_28] : memref<1x256xf32, #tpu.memory_space<vmem>>, vector<1x256xf32>
    %37 = vector.broadcast %36 : vector<1x256xf32> to vector<8x256xf32>
    %38 = arith.addf %35, %37 : vector<8x256xf32>
    %cst_29 = arith.constant 0.000000e+00 : f32
    %39 = vector.broadcast %cst_29 : f32 to vector<8x256xf32>
    %40 = arith.maximumf %38, %39 : vector<8x256xf32>
    %41 = arith.truncf %40 : vector<8x256xf32> to vector<8x256xbf16>
    %c0_30 = arith.constant 0 : index
    %c0_31 = arith.constant 0 : index
    %42 = vector.load %arg12[%c0_30, %c0_31] : memref<256x784xbf16, #tpu.memory_space<vmem>>, vector<256x784xbf16>
    %cst_32 = arith.constant dense<0.000000e+00> : vector<8x784xf32>
    %43 = tpu.matmul %41, %42, %cst_32 {dimension_numbers = #tpu.dot_dimension_numbers<[1], [0], [0], [1], [0, 0, 1, 1], [], []>} : vector<8x256xbf16>, vector<256x784xbf16>, vector<8x784xf32> -> vector<8x784xf32>
    %c0_33 = arith.constant 0 : index
    %c0_34 = arith.constant 0 : index
    %44 = vector.load %arg13[%c0_33, %c0_34] : memref<1x784xf32, #tpu.memory_space<vmem>>, vector<1x784xf32>
    %45 = vector.broadcast %44 : vector<1x784xf32> to vector<8x784xf32>
    %46 = arith.addf %43, %45 : vector<8x784xf32>
    %cst_35 = arith.constant 5.000000e-01 : f32
    %47 = vector.broadcast %cst_35 : f32 to vector<8x784xf32>
    %48 = arith.mulf %47, %46 : vector<8x784xf32>
    %49 = math.tanh %48 : vector<8x784xf32>
    %cst_36 = arith.constant 5.000000e-01 : f32
    %50 = vector.broadcast %cst_36 : f32 to vector<8x784xf32>
    %51 = arith.mulf %50, %49 : vector<8x784xf32>
    %cst_37 = arith.constant 5.000000e-01 : f32
    %52 = vector.broadcast %cst_37 : f32 to vector<8x784xf32>
    %53 = arith.addf %51, %52 : vector<8x784xf32>
    %c0_38 = arith.constant 0 : index
    %c0_39 = arith.constant 0 : index
    %54 = vector.load %arg14[%c0_38, %c0_39] : memref<8x784xf32, #tpu.memory_space<vmem>>, vector<8x784xf32>
    tpu.vector_store %arg14[%c0_38, %c0_39], %53 {strides = array<i32>} : memref<8x784xf32, #tpu.memory_space<vmem>>, vector<8x784xf32>,
    return
  }
  func.func @transform_0(%arg0: i32) -> (i32, i32) {
    %c0_i32 = arith.constant 0 : i32
    %c0_i32_0 = arith.constant 0 : i32
    return %arg0, %c0_i32 : i32, i32
  }
  func.func @transform_1(%arg0: i32) -> (i32, i32) {
    %c0_i32 = arith.constant 0 : i32
    %c0_i32_0 = arith.constant 0 : i32
    %c0_i32_1 = arith.constant 0 : i32
    return %c0_i32, %c0_i32_0 : i32, i32
  }
  func.func @transform_2(%arg0: i32) -> (i32, i32) {
    %c0_i32 = arith.constant 0 : i32
    %c0_i32_0 = arith.constant 0 : i32
    %c0_i32_1 = arith.constant 0 : i32
    return %c0_i32, %c0_i32_0 : i32, i32
  }
  func.func @transform_3(%arg0: i32) -> (i32, i32) {
    %c0_i32 = arith.constant 0 : i32
    %c0_i32_0 = arith.constant 0 : i32
    %c0_i32_1 = arith.constant 0 : i32
    return %c0_i32, %c0_i32_0 : i32, i32
  }
  func.func @transform_4(%arg0: i32) -> (i32, i32) {
    %c0_i32 = arith.constant 0 : i32
    %c0_i32_0 = arith.constant 0 : i32
    %c0_i32_1 = arith.constant 0 : i32
    return %c0_i32, %c0_i32_0 : i32, i32
  }
  func.func @transform_5(%arg0: i32) -> (i32, i32) {
    %c0_i32 = arith.constant 0 : i32
    %c0_i32_0 = arith.constant 0 : i32
    %c0_i32_1 = arith.constant 0 : i32
    return %c0_i32, %c0_i32_0 : i32, i32
  }
  func.func @transform_6(%arg0: i32) -> (i32, i32) {
    %c0_i32 = arith.constant 0 : i32
    %c0_i32_0 = arith.constant 0 : i32
    %c0_i32_1 = arith.constant 0 : i32
    return %c0_i32, %c0_i32_0 : i32, i32
  }
  func.func @transform_7(%arg0: i32) -> (i32, i32) {
    %c0_i32 = arith.constant 0 : i32
    %c0_i32_0 = arith.constant 0 : i32
    %c0_i32_1 = arith.constant 0 : i32
    return %c0_i32, %c0_i32_0 : i32, i32
  }
  func.func @transform_8(%arg0: i32) -> (i32, i32) {
    %c0_i32 = arith.constant 0 : i32
    %c0_i32_0 = arith.constant 0 : i32
    %c0_i32_1 = arith.constant 0 : i32
    return %c0_i32, %c0_i32_0 : i32, i32
  }
  func.func @transform_9(%arg0: i32) -> (i32, i32) {
    %c0_i32 = arith.constant 0 : i32
    %c0_i32_0 = arith.constant 0 : i32
    %c0_i32_1 = arith.constant 0 : i32
    return %c0_i32, %c0_i32_0 : i32, i32
  }
  func.func @transform_10(%arg0: i32) -> (i32, i32) {
    %c0_i32 = arith.constant 0 : i32
    %c0_i32_0 = arith.constant 0 : i32
    %c0_i32_1 = arith.constant 0 : i32
    return %c0_i32, %c0_i32_0 : i32, i32
  }
  func.func @transform_11(%arg0: i32) -> (i32, i32) {
    %c0_i32 = arith.constant 0 : i32
    %c0_i32_0 = arith.constant 0 : i32
    %c0_i32_1 = arith.constant 0 : i32
    return %c0_i32, %c0_i32_0 : i32, i32
  }
  func.func @transform_12(%arg0: i32) -> (i32, i32) {
    %c0_i32 = arith.constant 0 : i32
    %c0_i32_0 = arith.constant 0 : i32
    %c0_i32_1 = arith.constant 0 : i32
    return %c0_i32, %c0_i32_0 : i32, i32
  }
  func.func @transform_13(%arg0: i32) -> (i32, i32) {
    %c0_i32 = arith.constant 0 : i32
    %c0_i32_0 = arith.constant 0 : i32
    return %arg0, %c0_i32 : i32, i32
  }
}

</mosaic_0001>

<bundles_post_ra>
// kernel: _ae_forward_impl.1
= control target key start
LH: loop header
LB: loop body
LE: loop exit
PB: predicated region body
PF: predicated region fallthrough
CT: control target
= control target key end

     0   :  { %s3797_s0 = inlined_call_operand.vmem [shape: f32[8,784], index: 0, kind: input, shape index: {}]   ;;  %s3798_s1 = inlined_call_operand.vmem [shape: bf16[784,256], index: 1, kind: input, shape index: {}]   ;;  %s3799_s2 = inlined_call_operand.vmem [shape: f32[1,256], index: 2, kind: input, shape index: {}]   ;;  %s3800_s3 = inlined_call_operand.vmem [shape: bf16[256,64], index: 3, kind: input, shape index: {}]   ;;  %s3801_s4 = inlined_call_operand.vmem [shape: f32[1,64], index: 4, kind: input, shape index: {}]   ;;  %s3802_s5 = inlined_call_operand.vmem [shape: bf16[64,20], index: 5, kind: input, shape index: {}]   ;;  %s3803_s6 = inlined_call_operand.vmem [shape: f32[1,20], index: 6, kind: input, shape index: {}]   ;;  %s3804_s7 = inlined_call_operand.vmem [shape: bf16[20,64], index: 7, kind: input, shape index: {}]   ;;  %s3805_s8 = inlined_call_operand.vmem [shape: f32[1,64], index: 8, kind: input, shape index: {}]   ;;  %s3806_s9 = inlined_call_operand.vmem [shape: bf16[64,256], index: 9, kind: input, shape index: {}]   ;;  %s3807_s10 = inlined_call_operand.vmem [shape: f32[1,256], index: 10, kind: input, shape index: {}]   ;;  %s3808_s11 = inlined_call_operand.vmem [shape: bf16[256,784], index: 11, kind: input, shape index: {}]   ;;  %s3809_s12 = inlined_call_operand.vmem [shape: f32[1,784], index: 12, kind: input, shape index: {}]   ;;  %s3810_s13 = inlined_call_operand.hbm [shape: f32[8,784], index: 13, kind: output, shape index: {}]  }
   0x1   :  { %v2547_v0 = vld [vmem:[%s3798_s1 + $0x74] ss:$8 sps:$4 sm:$0xff]   ;;  %v2549_v1 = vld [vmem:[%s3798_s1 + $0x70] ss:$8 sps:$4 sm:$0xff]   ;;  %v2553_v4 = vld [vmem:[%s3798_s1 + $0x64] ss:$8 sps:$4 sm:$0xff]  }
   0x2   :  { %664 = vmatprep.subr.bf16.mxu0 %v2547_v0  ;;  %v2550_v2 = vld [vmem:[%s3798_s1 + $0x174] ss:$8 sps:$4 sm:$0xff]   ;;  %v2552_v3 = vld [vmem:[%s3798_s1 + $0x170] ss:$8 sps:$4 sm:$0xff]   ;;  %v2555_v5 = vld [vmem:[%s3798_s1 + $0x60] ss:$8 sps:$4 sm:$0xff]  }
   0x3   :  { %665 = vmatpush1.bf16.msra.mxu0 %v2549_v1  ;;  %705 = vmatprep.subr.bf16.mxu1 %v2550_v2  ;;  %v2556_v6 = vld [vmem:[%s3798_s1 + $0x164] ss:$8 sps:$4 sm:$0xff]   ;;  %v2558_v7 = vld [vmem:[%s3798_s1 + $0x160] ss:$8 sps:$4 sm:$0xff]   ;;  %v2559_v8 = vld [vmem:[%s3798_s1 + $0x54] ss:$8 sps:$4 sm:$0xff]  }
   0x4   :  { %706 = vmatpush1.bf16.msra.mxu1 %v2552_v3  ;;  %666 = vmatprep.subr.bf16.mxu0 %v2553_v4  ;;  %v2561_v9 = vld [vmem:[%s3798_s1 + $0x50] ss:$8 sps:$4 sm:$0xff]   ;;  %v2562_v10 = vld [vmem:[%s3798_s1 + $0x154] ss:$8 sps:$4 sm:$0xff]   ;;  %v2565_v11 = vld [vmem:[%s3798_s1 + $0x44] ss:$8 sps:$4 sm:$0xff]  }
   0x5   :  { %707 = vmatprep.subr.bf16.mxu1 %v2556_v6  ;;  %v2564_v12 = vld [vmem:[%s3798_s1 + $0x150] ss:$8 sps:$4 sm:$0xff]   ;;  %v2568_v13 = vld [vmem:[%s3798_s1 + $0x144] ss:$8 sps:$4 sm:$0xff]   ;;  %v2567_v14 = vld [vmem:[%s3798_s1 + $0x40] ss:$8 sps:$4 sm:$0xff]  }
   0x6   :  { %v2571_v15 = vld [vmem:[%s3798_s1 + $0x34] ss:$8 sps:$4 sm:$0xff]   ;;  %v2570_v16 = vld [vmem:[%s3798_s1 + $0x140] ss:$8 sps:$4 sm:$0xff]   ;;  %v2573_v18 = vld [vmem:[%s3798_s1 + $0x30] ss:$8 sps:$4 sm:$0xff]  }
   0x7   :  { %667 = vmatpush1.bf16.msra.mxu0 %v2555_v5  ;;  %v2574_v17 = vld [vmem:[%s3798_s1 + $0x134] ss:$8 sps:$4 sm:$0xff]   ;;  %v2577_v19 = vld [vmem:[%s3798_s1 + $0x24] ss:$8 sps:$4 sm:$0xff]   ;;  %v2576_v20 = vld [vmem:[%s3798_s1 + $0x130] ss:$8 sps:$4 sm:$0xff]  }
   0x8   :  { %668 = vmatprep.subr.bf16.mxu0 %v2559_v8  ;;  %708 = vmatpush1.bf16.msra.mxu1 %v2558_v7  ;;  %v2580_v21 = vld [vmem:[%s3798_s1 + $0x124] ss:$8 sps:$4 sm:$0xff]   ;;  %v2579_v22 = vld [vmem:[%s3798_s1 + $0x20] ss:$8 sps:$4 sm:$0xff]   ;;  %v2583_v23 = vld [vmem:[%s3798_s1 + $0x14] ss:$8 sps:$4 sm:$0xff]  }
   0x9   :  { %709 = vmatprep.subr.bf16.mxu1 %v2562_v10  ;;  %v2582_v24 = vld [vmem:[%s3798_s1 + $0x120] ss:$8 sps:$4 sm:$0xff]   ;;  %v2586_v25 = vld [vmem:[%s3798_s1 + $0x114] ss:$8 sps:$4 sm:$0xff]   ;;  %v2585_v26 = vld [vmem:[%s3798_s1 + $0x10] ss:$8 sps:$4 sm:$0xff]  }
   0xa   :  { %v2589_v27 = vld [vmem:[%s3798_s1 + $0x4] ss:$8 sps:$4 sm:$0xff]   ;;  %v2588_v28 = vld [vmem:[%s3798_s1 + $0x110] ss:$8 sps:$4 sm:$0xff]   ;;  %v2591_v30 = vld [vmem:[%s3798_s1] ss:$8 sps:$4 sm:$0xff]  }
   0xb   :  { %669 = vmatpush1.bf16.msra.mxu0 %v2561_v9  ;;  %v2592_v29 = vld [vmem:[%s3798_s1 + $0x104] ss:$8 sps:$4 sm:$0xff]   ;;  %v2595_v31 = vld [vmem:[%s3798_s1 + $0xf4] ss:$8 sps:$4 sm:$0xff]   ;;  %v2594_v32 = vld [vmem:[%s3798_s1 + $0x100] ss:$8 sps:$4 sm:$0xff]  }
   0xc   :  { %670 = vmatprep.subr.bf16.mxu0 %v2565_v11  ;;  %710 = vmatpush1.bf16.msra.mxu1 %v2564_v12  ;;  %v2598_v33 = vld [vmem:[%s3798_s1 + $0x1f4] ss:$8 sps:$4 sm:$0xff]   ;;  %v2597_v34 = vld [vmem:[%s3798_s1 + $0xf0] ss:$8 sps:$4 sm:$0xff]   ;;  %v2601_v35 = vld [vmem:[%s3798_s1 + $0xe4] ss:$8 sps:$4 sm:$0xff]  }
   0xd   :  { %711 = vmatprep.subr.bf16.mxu1 %v2568_v13  ;;  %v2600_v36 = vld [vmem:[%s3798_s1 + $0x1f0] ss:$8 sps:$4 sm:$0xff]   ;;  %v2604_v37 = vld [vmem:[%s3798_s1 + $0x1e4] ss:$8 sps:$4 sm:$0xff]   ;;  %v2603_v38 = vld [vmem:[%s3798_s1 + $0xe0] ss:$8 sps:$4 sm:$0xff]  }
   0xe   :  { %v2607_v39 = vld [vmem:[%s3798_s1 + $0xd4] ss:$8 sps:$4 sm:$0xff]   ;;  %v2606_v40 = vld [vmem:[%s3798_s1 + $0x1e0] ss:$8 sps:$4 sm:$0xff]   ;;  %v2609_v42 = vld [vmem:[%s3798_s1 + $0xd0] ss:$8 sps:$4 sm:$0xff]  }
   0xf   :  { %671 = vmatpush1.bf16.msra.mxu0 %v2567_v14  ;;  %v2610_v41 = vld [vmem:[%s3798_s1 + $0x1d4] ss:$8 sps:$4 sm:$0xff]   ;;  %v2613_v43 = vld [vmem:[%s3798_s1 + $0xc4] ss:$8 sps:$4 sm:$0xff]   ;;  %v2612_v44 = vld [vmem:[%s3798_s1 + $0x1d0] ss:$8 sps:$4 sm:$0xff]  }
  0x10   :  { %672 = vmatprep.subr.bf16.mxu0 %v2571_v15  ;;  %712 = vmatpush1.bf16.msra.mxu1 %v2570_v16  ;;  %v2616_v45 = vld [vmem:[%s3798_s1 + $0x1c4] ss:$8 sps:$4 sm:$0xff]   ;;  %v2615_v47 = vld [vmem:[%s3798_s1 + $0xc0] ss:$8 sps:$4 sm:$0xff]   ;;  %v2619_v49 = vld [vmem:[%s3798_s1 + $0xb4] ss:$8 sps:$4 sm:$0xff]  }
  0x11   :  { %713 = vmatprep.subr.bf16.mxu1 %v2574_v17  ;;  %v47_v46 = vld [vmem:[%s3797_s0 + $0x8] sm:$0xff]  ;;  %v49_v50 = vld [vmem:[%s3797_s0 + $0x18] sm:$0xff]  ;;  %v46_v4 = vld [vmem:[%s3797_s0] sm:$0xff] }
  0x12   :  { %v54_v48 = vpack.c.bf16 %v47_v46, %v47_v46  ;;  %v2618_v51 = vld [vmem:[%s3798_s1 + $0x1c0] ss:$8 sps:$4 sm:$0xff]   ;;  %v56_v52 = vpack.c.bf16 %v49_v50, %v49_v50  ;;  %v2622_v53 = vld [vmem:[%s3798_s1 + $0x1b4] ss:$8 sps:$4 sm:$0xff]   ;;  %v2621_v54 = vld [vmem:[%s3798_s1 + $0xb0] ss:$8 sps:$4 sm:$0xff]   ;;  %v53_v7 = vpack.c.bf16 %v46_v4, %v46_v4 }
  0x13   :  { %673 = vmatpush1.bf16.msra.mxu0 %v2573_v18  ;;  %v2625_v55 = vld [vmem:[%s3798_s1 + $0xa4] ss:$8 sps:$4 sm:$0xff]   ;;  %v2624_v56 = vld [vmem:[%s3798_s1 + $0x1b0] ss:$8 sps:$4 sm:$0xff]   ;;  %v2627_v58 = vld [vmem:[%s3798_s1 + $0xa0] ss:$8 sps:$4 sm:$0xff]  }
  0x14   :  { %674 = vmatprep.subr.bf16.mxu0 %v2577_v19  ;;  %714 = vmatpush1.bf16.msra.mxu1 %v2576_v20  ;;  %v2628_v57 = vld [vmem:[%s3798_s1 + $0x1a4] ss:$8 sps:$4 sm:$0xff]   ;;  %v2631_v59 = vld [vmem:[%s3798_s1 + $0x94] ss:$8 sps:$4 sm:$0xff]   ;;  %v2630_v60 = vld [vmem:[%s3798_s1 + $0x1a0] ss:$8 sps:$4 sm:$0xff]  }
  0x15   :  { %715 = vmatprep.subr.bf16.mxu1 %v2580_v21  ;;  %696 = vmatprep.mubr.bf16.mxu0 %v54_v48  ;;  %v2634_v61 = vld [vmem:[%s3798_s1 + $0x194] ss:$8 sps:$4 sm:$0xff]   ;;  %v2633_v62 = vld [vmem:[%s3798_s1 + $0x90] ss:$8 sps:$4 sm:$0xff]   ;;  %v2637_v63 = vld [vmem:[%s3798_s1 + $0x84] ss:$8 sps:$4 sm:$0xff]  }
  0x16   :  { %737 = vmatprep.mubr.bf16.mxu1 %v56_v52  ;;  %v2636_v0 = vld [vmem:[%s3798_s1 + $0x190] ss:$8 sps:$4 sm:$0xff]   ;;  %v2639_v1 = vld [vmem:[%s3798_s1 + $0x80] ss:$8 sps:$4 sm:$0xff]   ;;  %v2640_v2 = vld [vmem:[%s3798_s1 + $0x184] ss:$8 sps:$4 sm:$0xff]  }
  0x17   :  { %675 = vmatpush1.bf16.msra.mxu0 %v2579_v22  ;;  %v2642_v3 = vld [vmem:[%s3798_s1 + $0x180] ss:$8 sps:$4 sm:$0xff]   ;;  %v2645_v5 = vld [vmem:[%s3798_s1 + $0x274] ss:$8 sps:$4 sm:$0xff]   ;;  %v2643_v8 = vld [vmem:[%s3798_s1 + $0x270] ss:$8 sps:$4 sm:$0xff]  }
  0x18   :  { %676 = vmatprep.subr.bf16.mxu0 %v2583_v23  ;;  %716 = vmatpush1.bf16.msra.mxu1 %v2582_v24  ;;  %v48_v6 = vld [vmem:[%s3797_s0 + $0x10] sm:$0xff]  ;;  %v2648_v10 = vld [vmem:[%s3798_s1 + $0x264] ss:$8 sps:$4 sm:$0xff]   ;;  %v2646_v13 = vld [vmem:[%s3798_s1 + $0x260] ss:$8 sps:$4 sm:$0xff]  }
  0x19   :  { %717 = vmatprep.subr.bf16.mxu1 %v2586_v25  ;;  %v55_v9 = vpack.c.bf16 %v48_v6, %v48_v6  ;;  %v51_v11 = vld [vmem:[%s3797_s0 + $0x28] sm:$0xff]  ;;  %v2651_v14 = vld [vmem:[%s3798_s1 + $0x254] ss:$8 sps:$4 sm:$0xff]   ;;  %v2649_v15 = vld [vmem:[%s3798_s1 + $0x250] ss:$8 sps:$4 sm:$0xff]  }
  0x1a   :  { %v58_v12 = vpack.c.bf16 %v51_v11, %v51_v11  ;;  %v2654_v16 = vld [vmem:[%s3798_s1 + $0x244] ss:$8 sps:$4 sm:$0xff]   ;;  %v2652_v17 = vld [vmem:[%s3798_s1 + $0x240] ss:$8 sps:$4 sm:$0xff]   ;;  %v2657_v18 = vld [vmem:[%s3798_s1 + $0x234] ss:$8 sps:$4 sm:$0xff]  }
  0x1b   :  { %677 = vmatpush1.bf16.msra.mxu0 %v2585_v26  ;;  %v2655_v19 = vld [vmem:[%s3798_s1 + $0x230] ss:$8 sps:$4 sm:$0xff]   ;;  %v2660_v20 = vld [vmem:[%s3798_s1 + $0x224] ss:$8 sps:$4 sm:$0xff]   ;;  %v2658_v21 = vld [vmem:[%s3798_s1 + $0x220] ss:$8 sps:$4 sm:$0xff]  }
  0x1c   :  { %678 = vmatprep.subr.bf16.mxu0 %v2589_v27  ;;  %718 = vmatpush1.bf16.msra.mxu1 %v2588_v28  ;;  %v2663_v22 = vld [vmem:[%s3798_s1 + $0x214] ss:$8 sps:$4 sm:$0xff]   ;;  %v2661_v23 = vld [vmem:[%s3798_s1 + $0x210] ss:$8 sps:$4 sm:$0xff]   ;;  %v2666_v24 = vld [vmem:[%s3798_s1 + $0x204] ss:$8 sps:$4 sm:$0xff]  }
  0x1d   :  { %719 = vmatprep.subr.bf16.mxu1 %v2592_v29  ;;  %v2664_v25 = vld [vmem:[%s3798_s1 + $0x200] ss:$8 sps:$4 sm:$0xff]   ;;  %v2669_v26 = vld [vmem:[%s3798_s1 + $0x2f4] ss:$8 sps:$4 sm:$0xff]   ;;  %v2667_v27 = vld [vmem:[%s3798_s1 + $0x2f0] ss:$8 sps:$4 sm:$0xff]  }
  0x1e   :  { %v2672_v28 = vld [vmem:[%s3798_s1 + $0x2e4] ss:$8 sps:$4 sm:$0xff]   ;;  %v2670_v29 = vld [vmem:[%s3798_s1 + $0x2e0] ss:$8 sps:$4 sm:$0xff]  }
  0x1f   :  { %679 = vmatpush1.bf16.msra.mxu0 %v2591_v30  ;;  %v2675_v30 = vld [vmem:[%s3798_s1 + $0x2d4] ss:$8 sps:$4 sm:$0xff]  }
  0x20   :  { %680 = vmatprep.subr.bf16.mxu0 %v2595_v31  ;;  %720 = vmatpush1.bf16.msra.mxu1 %v2594_v32  ;;  %v2673_v31 = vld [vmem:[%s3798_s1 + $0x2d0] ss:$8 sps:$4 sm:$0xff]   ;;  %v2678_v32 = vld [vmem:[%s3798_s1 + $0x2c4] ss:$8 sps:$4 sm:$0xff]  }
  0x21   :  { %721 = vmatprep.subr.bf16.mxu1 %v2598_v33  ;;  %v2676_v33 = vld [vmem:[%s3798_s1 + $0x2c0] ss:$8 sps:$4 sm:$0xff]  }
  0x23   :  { %681 = vmatpush2.bf16.msra.mxu0 %v2597_v34  ;;  %v2681_v34 = vld [vmem:[%s3798_s1 + $0x2b4] ss:$8 sps:$4 sm:$0xff]  }
  0x24   :  { %682 = vmatprep.subr.bf16.mxu0 %v2601_v35  ;;  %722 = vmatpush2.bf16.msra.mxu1 %v2600_v36  ;;  %v2679_v35 = vld [vmem:[%s3798_s1 + $0x2b0] ss:$8 sps:$4 sm:$0xff]   ;;  %v2684_v36 = vld [vmem:[%s3798_s1 + $0x2a4] ss:$8 sps:$4 sm:$0xff]  }
  0x25   :  { %723 = vmatprep.subr.bf16.mxu1 %v2604_v37  ;;  %v2682_v37 = vld [vmem:[%s3798_s1 + $0x2a0] ss:$8 sps:$4 sm:$0xff]  }
  0x27   :  { %683 = vmatpush2.bf16.msra.mxu0 %v2603_v38  ;;  %v2687_v38 = vld [vmem:[%s3798_s1 + $0x294] ss:$8 sps:$4 sm:$0xff]  }
  0x28   :  { %684 = vmatprep.subr.bf16.mxu0 %v2607_v39  ;;  %724 = vmatpush2.bf16.msra.mxu1 %v2606_v40  ;;  %v2685_v39 = vld [vmem:[%s3798_s1 + $0x290] ss:$8 sps:$4 sm:$0xff]   ;;  %v2690_v40 = vld [vmem:[%s3798_s1 + $0x284] ss:$8 sps:$4 sm:$0xff]  }
  0x29   :  { %725 = vmatprep.subr.bf16.mxu1 %v2610_v41  ;;  %v2688_v41 = vld [vmem:[%s3798_s1 + $0x280] ss:$8 sps:$4 sm:$0xff]  }
  0x2b   :  { %685 = vmatpush2.bf16.msra.mxu0 %v2609_v42  ;;  %v50_v42 = vld [vmem:[%s3797_s0 + $0x20] sm:$0xff] }
  0x2c   :  { %686 = vmatprep.subr.bf16.mxu0 %v2613_v43  ;;  %726 = vmatpush2.bf16.msra.mxu1 %v2612_v44  ;;  %v2693_v43 = vld [vmem:[%s3798_s1 + $0x304] ss:$8 sps:$4 sm:$0xff]   ;;  %v2691_v44 = vld [vmem:[%s3798_s1 + $0x300] ss:$8 sps:$4 sm:$0xff]  }
  0x2d   :  { %727 = vmatprep.subr.bf16.mxu1 %v2616_v45  ;;  %v57_v45 = vpack.c.bf16 %v50_v42, %v50_v42 }
  0x2f   :  { %687 = vmatpush2.bf16.msra.mxu0 %v2615_v47 }
  0x30   :  { %688 = vmatprep.subr.bf16.mxu0 %v2619_v49  ;;  %728 = vmatpush2.bf16.msra.mxu1 %v2618_v51 }
  0x31   :  { %729 = vmatprep.subr.bf16.mxu1 %v2622_v53 }
  0x33   :  { %689 = vmatpush2.bf16.msra.mxu0 %v2621_v54 }
  0x34   :  { %690 = vmatprep.subr.bf16.mxu0 %v2625_v55  ;;  %730 = vmatpush2.bf16.msra.mxu1 %v2624_v56 }
  0x35   :  { %731 = vmatprep.subr.bf16.mxu1 %v2628_v57 }
  0x37   :  { %691 = vmatpush2.bf16.msra.mxu0 %v2627_v58 }
  0x38   :  { %692 = vmatprep.subr.bf16.mxu0 %v2631_v59  ;;  %732 = vmatpush2.bf16.msra.mxu1 %v2630_v60 }
  0x39   :  { %733 = vmatprep.subr.bf16.mxu1 %v2634_v61 }
  0x3b   :  { %693 = vmatpush2.bf16.msra.mxu0 %v2633_v62 }
  0x3c   :  { %694 = vmatprep.subr.bf16.mxu0 %v2637_v63  ;;  %734 = vmatpush2.bf16.msra.mxu1 %v2636_v0 }
  0x3d   :  { %735 = vmatprep.subr.bf16.mxu1 %v2640_v2 }
  0x3f   :  { %695 = vmatpush2.bf16.msra.mxu0 %v2639_v1 }
  0x40   :  { %746 = vmatprep.subr.bf16.mxu0 %v2645_v5  ;;  %736 = vmatpush2.bf16.msra.mxu1 %v2642_v3 }
  0x42   :  { %697 = vmatmul.mubr.bf16.vlgmr.msra.gmra.mxu0 %v53_v7 }
  0x43   :  { %747 = vmatpush1.bf16.msra.mxu0 %v2643_v8  ;;  %738 = vmatmul.mubr.bf16.vlgmr.msra.gmra.mxu1 %v55_v9 }
  0x44   :  { %748 = vmatprep.subr.bf16.mxu0 %v2648_v10  ;;  %778 = vmatprep.mubr.bf16.mxu0 %v58_v12 }
  0x47   :  { %749 = vmatpush1.bf16.msra.mxu0 %v2646_v13 }
  0x48   :  { %750 = vmatprep.subr.bf16.mxu0 %v2651_v14 }
  0x4b   :  { %751 = vmatpush1.bf16.msra.mxu0 %v2649_v15 }
  0x4c   :  { %752 = vmatprep.subr.bf16.mxu0 %v2654_v16 }
  0x4f   :  { %753 = vmatpush1.bf16.msra.mxu0 %v2652_v17 }
  0x50   :  { %754 = vmatprep.subr.bf16.mxu0 %v2657_v18 }
  0x53   :  { %755 = vmatpush1.bf16.msra.mxu0 %v2655_v19 }
  0x54   :  { %756 = vmatprep.subr.bf16.mxu0 %v2660_v20 }
  0x57   :  { %757 = vmatpush1.bf16.msra.mxu0 %v2658_v21 }
  0x58   :  { %758 = vmatprep.subr.bf16.mxu0 %v2663_v22 }
  0x5b   :  { %759 = vmatpush1.bf16.msra.mxu0 %v2661_v23 }
  0x5c   :  { %760 = vmatprep.subr.bf16.mxu0 %v2666_v24 }
  0x5f   :  { %761 = vmatpush1.bf16.msra.mxu0 %v2664_v25 }
  0x60   :  { %762 = vmatprep.subr.bf16.mxu0 %v2669_v26 }
  0x63   :  { %763 = vmatpush2.bf16.msra.mxu0 %v2667_v27 }
  0x64   :  { %764 = vmatprep.subr.bf16.mxu0 %v2672_v28 }
  0x67   :  { %765 = vmatpush2.bf16.msra.mxu0 %v2670_v29 }
  0x68   :  { %766 = vmatprep.subr.bf16.mxu0 %v2675_v30 }
  0x6b   :  { %767 = vmatpush2.bf16.msra.mxu0 %v2673_v31 }
  0x6c   :  { %768 = vmatprep.subr.bf16.mxu0 %v2678_v32 }
  0x6f   :  { %769 = vmatpush2.bf16.msra.mxu0 %v2676_v33 }
  0x70   :  { %770 = vmatprep.subr.bf16.mxu0 %v2681_v34 }
  0x73   :  { %771 = vmatpush2.bf16.msra.mxu0 %v2679_v35 }
  0x74   :  { %772 = vmatprep.subr.bf16.mxu0 %v2684_v36 }
  0x77   :  { %773 = vmatpush2.bf16.msra.mxu0 %v2682_v37 }
  0x78   :  { %774 = vmatprep.subr.bf16.mxu0 %v2687_v38 }
  0x7b   :  { %775 = vmatpush2.bf16.msra.mxu0 %v2685_v39 }
  0x7c   :  { %776 = vmatprep.subr.bf16.mxu0 %v2690_v40 }
  0x7f   :  { %777 = vmatpush2.bf16.msra.mxu0 %v2688_v41 }
  0x80   :  { %18 = vsyncpa [#allocation3], 0  ;;  %801 = vmatprep.subr.bf16.mxu0 %v2693_v43  ;;  %v2924_v46 = vmov 0   ;;  %v52_v47 = vld [vmem:[%s3797_s0 + $0x30] sm:$0xff]  ;;  %vm660_vm0 = vcmask 130048   ;;  %v2694_v49 = vld [vmem:[%s3800_s3 + $0x78] sm:$0xff]   ;;  %v160_v2 = vlaneseq }
  0x81   :  { %v59_v48 = vpack.c.bf16 %v52_v47, %v52_v47  ;;  %v2695_v50 = vld [vmem:[%s3800_s3 + $0x38] sm:$0xff]   ;;  %v2696_v51 = vld [vmem:[%s3800_s3 + $0x70] sm:$0xff]   ;;  %2471 = vmatprep.subr.bf16.mxu1 %v2694_v49  ;;  %v2698_v53 = vld [vmem:[%s3800_s3 + $0x68] sm:$0xff]   ;;  %v2925_v1 = vmov 0.0   ;;  %vm2926_vm1 = vmmov 0   ;;  %vm1048_vm2 = vcmask 523264  }
  0x82   :  { %779 = vmatmul.mubr.bf16.vlgmr.msra.gmra.mxu0 %v57_v45  ;;  %2472 = vmatpush3.bf16.msra.mxu1 %v2695_v50  ;;  %v2697_v52 = vld [vmem:[%s3800_s3 + $0x30] sm:$0xff]   ;;  %v2699_v54 = vld [vmem:[%s3800_s3 + $0x28] sm:$0xff]   ;;  %v2700_v55 = vld [vmem:[%s3800_s3 + $0x60] sm:$0xff]   ;;  %v3363_v3 = vshrl.u32 %v160_v2, 7  ;;  %vm1117_vm3 = vcmask 1041408   ;;  %vm1113_vm4 = vcmask 162816  }
  0x83   :  { %802 = vmatpush1.bf16.msra.mxu0 %v2691_v44  ;;  %819 = vmatprep.mubr.bf16.mxu0 %v2924_v46  ;;  %v2701_v56 = vld [vmem:[%s3800_s3 + $0x20] sm:$0xff]   ;;  %v2702_v57 = vld [vmem:[%s3800_s3 + $0x58] sm:$0xff]   ;;  %v2704_v59 = vld [vmem:[%s3800_s3 + $0x50] sm:$0xff]  }
  0x84   :  { %2473 = vmatprep.subr.bf16.mxu1 %v2696_v51  ;;  %v2703_v58 = vld [vmem:[%s3800_s3 + $0x18] sm:$0xff]   ;;  %v2705_v60 = vld [vmem:[%s3800_s3 + $0x10] sm:$0xff]   ;;  %v2706_v61 = vld [vmem:[%s3800_s3 + $0x48] sm:$0xff]   ;;  %v3366_v4 = vsub.s32 0, %v3363_v3  ;;  %v3372_v6 = vsub.s32 1, %v3363_v3 }
  0x85   :  { %v2707_v62 = vld [vmem:[%s3800_s3 + $0x8] sm:$0xff]   ;;  %v2708_v63 = vld [vmem:[%s3800_s3 + $0x40] sm:$0xff]   ;;  %v2710_v36 = vld [vmem:[%s3802_s5 + $0x18] sm:$0xff]  }
  0x86   :  { %2474 = vmatpush3.bf16.msra.mxu1 %v2697_v52  ;;  %v2709_v0 = vld [vmem:[%s3800_s3] sm:$0xff]   ;;  %v2711_v38 = vld [vmem:[%s3802_s5 + $0x10] sm:$0xff]   ;;  %v2712_v39 = vld [vmem:[%s3802_s5 + $0x8] sm:$0xff]  }
  0x87   :  { %2475 = vmatprep.subr.bf16.mxu1 %v2698_v53  ;;  %v158_v5 = vld [vmem:[%s3799_s2] sm:$0x3]  ;;  %v2714_v50 = vld [vmem:[%s3804_s7 + $0x8] ss:$0 sps:$4 sm:$0x33]  }
  0x88   :  { %v163_v7 = vrot.slane %v158_v5, %v3366_v4  ;;  %v167_v8 = vrot.slane %v158_v5, %v3372_v6  ;;  %v2713_v40 = vld [vmem:[%s3802_s5] sm:$0xff]   ;;  %v1119_v51 = vsel %vm1117_vm3, %v2714_v50, 0  ;;  %v2716_v53 = vld [vmem:[%s3806_s9 + $0x30] ss:$8 sps:$4 sm:$0xff]   ;;  %v2751_v50 = vld [vmem:[%s3808_s11 + $0xec] ss:$28 sps:$4 sm:$0xff]  }
  0x89   :  { %v2323_v42 = vld [vmem:[%s3801_s4] ss:$0 sm:$0xff]  ;;  %v2727_v5 = vld [vmem:[%s3806_s9 + $0x4] ss:$8 sps:$4 sm:$0xff]  }
  0x8a   :  { %2322 = vmatmul.mubr.msk.bf16.vlgmr.msra.gmra.mxu0 %vm660_vm0, %v59_v48  ;;  %2476 = vmatpush3.bf16.msra.mxu1 %v2699_v54  ;;  %v2715_v52 = vld [vmem:[%s3804_s7] sm:$0xff]   ;;  %v2718_v54 = vld [vmem:[%s3806_s9 + $0x34] ss:$8 sps:$4 sm:$0xff]  }
  0x8b   :  { %1258 = vmatprep.mubr.bf16.mxu0 %v2924_v46  ;;  %2477 = vmatprep.subr.bf16.mxu1 %v2700_v55  ;;  %v2721_v55 = vld [vmem:[%s3806_s9 + $0x24] ss:$8 sps:$4 sm:$0xff]  }
  0x8c   :  { %1234 = vmatprep.subr.bf16.mxu0 %v2718_v54  ;;  %v2763_v54 = vld [vmem:[%s3808_s11 + $0x7c] ss:$28 sps:$4 sm:$0xff]  }
  0x8d   :  { %1235 = vmatpush1.bf16.msra.mxu0 %v2716_v53  ;;  %v2755_v53 = vld [vmem:[%s3808_s11 + $0xb0] ss:$28 sps:$4 sm:$0xff]  }
  0x8e   :  { %2478 = vmatpush3.bf16.msra.mxu1 %v2701_v56  ;;  %v2719_v56 = vld [vmem:[%s3806_s9 + $0x20] ss:$8 sps:$4 sm:$0xff]   ;;  %1236 = vmatprep.subr.bf16.mxu0 %v2721_v55  ;;  %v2761_v55 = vld [vmem:[%s3808_s11 + $0x78] ss:$28 sps:$4 sm:$0xff]  }
  0x8f   :  { %2479 = vmatprep.subr.bf16.mxu1 %v2702_v57  ;;  %v2724_v57 = vld [vmem:[%s3806_s9 + $0x14] ss:$8 sps:$4 sm:$0xff]  }
  0x91   :  { %1237 = vmatpush1.bf16.msra.mxu0 %v2719_v56  ;;  %v2769_v56 = vld [vmem:[%s3808_s11 + $0x44] ss:$28 sps:$4 sm:$0xff]  }
  0x92   :  { %2480 = vmatpush3.bf16.msra.mxu1 %v2703_v58  ;;  %v2722_v58 = vld [vmem:[%s3806_s9 + $0x10] ss:$8 sps:$4 sm:$0xff]   ;;  %1238 = vmatprep.subr.bf16.mxu0 %v2724_v57  ;;  %v2767_v57 = vld [vmem:[%s3808_s11 + $0x40] ss:$28 sps:$4 sm:$0xff]  }
  0x93   :  { %2481 = vmatprep.subr.bf16.mxu1 %v2704_v59  ;;  %v2340_v59 = vld [vmem:[%s3803_s6] ss:$0 sm:$0xff] }
  0x95   :  { %1239 = vmatpush1.bf16.msra.mxu0 %v2722_v58  ;;  %v2775_v58 = vld [vmem:[%s3808_s11 + $0xc] ss:$28 sps:$4 sm:$0xff]  }
  0x96   :  { %2482 = vmatpush3.bf16.msra.mxu1 %v2705_v60  ;;  %1240 = vmatprep.subr.bf16.mxu0 %v2727_v5  ;;  %v2797_v5 = vld [vmem:[%s3808_s11 + $0x2a8] ss:$28 sps:$4 sm:$0xff]  }
  0x97   :  { %2483 = vmatprep.subr.bf16.mxu1 %v2706_v61 }
  0x9a   :  { %2484 = vmatpush3.bf16.msra.mxu1 %v2707_v62 }
  0x9b   :  { %2485 = vmatprep.subr.bf16.mxu1 %v2708_v63 }
  0x9e   :  { %2486 = vmatpush3.bf16.msra.mxu1 %v2709_v0 }
  0x9f   :  { %2523 = vmatprep.subr.bf16.mxu1 %v2925_v1 }
 0x102   :  { %v698_v9 = vpop.f32.mrf.mxu0 }
 0x103   :  { %v699_v10 = vadd.f32 %v698_v9, %v163_v7  ;;  %v739_v12 = vpop.f32.mrf.mxu1  ;;  %v2725_v7 = vld [vmem:[%s3806_s9] ss:$8 sps:$4 sm:$0xff]  }
 0x104   :  { %v700_v11 = vpop.f32.mrf.mxu0  ;;  %1241 = vmatpush1.bf16.msra.mxu0 %v2725_v7  ;;  %v2730_v9 = vld [vmem:[%s3808_s11 + $0x18c] ss:$28 sps:$4 sm:$0xff]   ;;  %v2805_v7 = vld [vmem:[%s3808_s11 + $0x274] ss:$28 sps:$4 sm:$0xff]  }
 0x105   :  { %v701_v13 = vadd.f32 %v700_v11, %v167_v8  ;;  %v740_v14 = vadd.f32 %v739_v12, %v699_v10  ;;  %v741_v16 = vpop.f32.mrf.mxu1  ;;  %v2728_v8 = vld [vmem:[%s3808_s11 + $0x188] ss:$28 sps:$4 sm:$0xff]   ;;  %v2733_v10 = vld [vmem:[%s3808_s11 + $0x194] ss:$28 sps:$4 sm:$0xff]  }
 0x106   :  { %v702_v15 = vpop.f32.mrf.mxu0  ;;  %v2736_v11 = vld [vmem:[%s3808_s11 + $0x154] ss:$28 sps:$4 sm:$0xff]   ;;  %2053 = vmatprep.subr.bf16.mxu0 %v2733_v10 }
 0x107   :  { %v742_v17 = vadd.f32 %v741_v16, %v701_v13  ;;  %v743_v19 = vpop.f32.mrf.mxu1  ;;  %v2734_v12 = vld [vmem:[%s3808_s11 + $0x150] ss:$28 sps:$4 sm:$0xff]   ;;  %v2742_v13 = vld [vmem:[%s3808_s11 + $0x11c] ss:$28 sps:$4 sm:$0xff]   ;;  %v2748_v15 = vld [vmem:[%s3808_s11 + $0xe4] ss:$28 sps:$4 sm:$0xff]  }
 0x108   :  { %v703_v18 = vpop.f32.mrf.mxu0  ;;  %v2746_v16 = vld [vmem:[%s3808_s11 + $0xe0] ss:$28 sps:$4 sm:$0xff]   ;;  %v2760_v19 = vld [vmem:[%s3808_s11 + $0x74] ss:$28 sps:$4 sm:$0xff]  }
 0x109   :  { %v744_v20 = vpop.f32.mrf.mxu1  ;;  %v2752_v18 = vld [vmem:[%s3808_s11 + $0xa8] ss:$28 sps:$4 sm:$0xff]   ;;  %v2809_v10 = vld [vmem:[%s3808_s11 + $0x238] ss:$28 sps:$4 sm:$0xff]  }
 0x10a   :  { %v2758_v20 = vld [vmem:[%s3808_s11 + $0x70] ss:$28 sps:$4 sm:$0xff]  }
 0x142   :  { %v780_v21 = vpop.f32.mrf.mxu0 }
 0x143   :  { %v781_v25 = vadd.f32 %v780_v21, %v740_v14  ;;  %v2740_v14 = vld [vmem:[%s3808_s11 + $0x118] ss:$28 sps:$4 sm:$0xff]  }
 0x144   :  { %v782_v22 = vpop.f32.mrf.mxu0  ;;  %v2766_v21 = vld [vmem:[%s3808_s11 + $0x3c] ss:$28 sps:$4 sm:$0xff]  }
 0x145   :  { %v783_v27 = vadd.f32 %v782_v22, %v742_v17  ;;  %v2754_v17 = vld [vmem:[%s3808_s11 + $0xac] ss:$28 sps:$4 sm:$0xff]   ;;  %v2764_v22 = vld [vmem:[%s3808_s11 + $0x38] ss:$28 sps:$4 sm:$0xff]  }
 0x146   :  { %v784_v23 = vpop.f32.mrf.mxu0 }
 0x147   :  { %v2772_v23 = vld [vmem:[%s3808_s11 + $0x4] ss:$28 sps:$4 sm:$0xff]  }
 0x148   :  { %v785_v24 = vpop.f32.mrf.mxu0 }
 0x149   :  { %v2770_v24 = vld [vmem:[%s3808_s11] ss:$28 sps:$4 sm:$0xff]  }
 0x14a   :  { %v821_v26 = vpop.f32.mrf.mxu0 }
 0x14b   :  { %v822_v28 = vadd.f32 %v821_v26, %v781_v25  ;;  %v2778_v25 = vld [vmem:[%s3808_s11 + $0x34c] ss:$28 sps:$4 sm:$0xff]  }
 0x14c   :  { %v823_v29 = vpop.f32.mrf.mxu0  ;;  %v2776_v26 = vld [vmem:[%s3808_s11 + $0x348] ss:$28 sps:$4 sm:$0xff]  }
 0x14d   :  { %v824_v30 = vadd.f32 %v823_v29, %v783_v27  ;;  %v828_v31 = vmax.f32 %v822_v28, 0.0  ;;  %v2784_v27 = vld [vmem:[%s3808_s11 + $0x314] ss:$28 sps:$4 sm:$0xff]   ;;  %v2790_v29 = vld [vmem:[%s3808_s11 + $0x2dc] ss:$28 sps:$4 sm:$0xff]  }
 0x14e   :  { %v825_v32 = vpop.f32.mrf.mxu0  ;;  %v2782_v28 = vld [vmem:[%s3808_s11 + $0x310] ss:$28 sps:$4 sm:$0xff]  }
 0x14f   :  { %v829_v33 = vmax.f32 %v824_v30, 0.0  ;;  %v830_v37 = vpack.c.bf16 %v828_v31, %v828_v31  ;;  %v2788_v30 = vld [vmem:[%s3808_s11 + $0x2d8] ss:$28 sps:$4 sm:$0xff]   ;;  %v2796_v31 = vld [vmem:[%s3808_s11 + $0x2a4] ss:$28 sps:$4 sm:$0xff]  }
 0x150   :  { %v826_v34 = vpop.f32.mrf.mxu0  ;;  %v2794_v32 = vld [vmem:[%s3808_s11 + $0x2a0] ss:$28 sps:$4 sm:$0xff]  }
 0x151   :  { %v831_v35 = vpack.c.bf16 %v829_v33, %v829_v33  ;;  %v2802_v33 = vld [vmem:[%s3808_s11 + $0x26c] ss:$28 sps:$4 sm:$0xff]  }
 0x152   :  { %v2800_v34 = vld [vmem:[%s3808_s11 + $0x268] ss:$28 sps:$4 sm:$0xff]  }
 0x153   :  { %999 = vmatprep.mubr.bf16.mxu1 %v831_v35  ;;  %v2808_v35 = vld [vmem:[%s3808_s11 + $0x234] ss:$28 sps:$4 sm:$0xff]  }
 0x154   :  { %1000 = vmatmul.mubr.bf16.vlgmr.msra.gmra.mxu1 %v830_v37  ;;  %v2346_v37 = vld [vmem:[%s3805_s8] ss:$0 sm:$0xff] }
 0x155   :  { %2524 = vmatpush3.bf16.msra.mxu1 %v2710_v36  ;;  %2531 = vmatprep.mubr.msk.bf16.mxu1 %vm2926_vm1, %v2925_v1  ;;  %v2806_v36 = vld [vmem:[%s3808_s11 + $0x230] ss:$28 sps:$4 sm:$0xff]  }
 0x156   :  { %2525 = vmatprep.subr.bf16.mxu1 %v2925_v1 }
 0x159   :  { %2526 = vmatpush3.bf16.msra.mxu1 %v2711_v38 }
 0x15a   :  { %2527 = vmatprep.subr.bf16.mxu1 %v2925_v1 }
 0x15d   :  { %2528 = vmatpush3.bf16.msra.mxu1 %v2712_v39 }
 0x15e   :  { %2529 = vmatprep.subr.bf16.mxu1 %v2925_v1 }
 0x161   :  { %2530 = vmatpush3.bf16.msra.mxu1 %v2713_v40 }
 0x162   :  { %2535 = vmatprep.subr.bf16.mxu1 %v2925_v1 }
 0x214   :  { %v2487_v41 = vpop.f32.mrf.mxu1 }
 0x216   :  { %v2488_v43 = vpop.f32.mrf.mxu1 }
 0x217   :  { %v2489_v44 = vadd.f32 %v2488_v43, %v2487_v41  ;;  %v2731_v43 = vld [vmem:[%s3808_s11 + $0x190] ss:$28 sps:$4 sm:$0xff]  }
 0x218   :  { %v2490_v45 = vpop.f32.mrf.mxu1 }
 0x219   :  { %v1002_v46 = vadd.f32 %v2489_v44, %v2323_v42  ;;  %v2739_v45 = vld [vmem:[%s3808_s11 + $0x15c] ss:$28 sps:$4 sm:$0xff]  }
 0x21a   :  { %v2491_v47 = vpop.f32.mrf.mxu1 }
 0x21b   :  { %v1007_v48 = vmax.f32 %v1002_v46, 0.0  ;;  %v2737_v47 = vld [vmem:[%s3808_s11 + $0x158] ss:$28 sps:$4 sm:$0xff]  }
 0x21d   :  { %v1008_v49 = vpack.c.bf16 %v1007_v48, %v1007_v48  ;;  %v2745_v48 = vld [vmem:[%s3808_s11 + $0x124] ss:$28 sps:$4 sm:$0xff]  }
 0x21f   :  { %2532 = vmatmul.mubr.msk.bf16.vlgmr.msra.gmra.mxu1 %vm1048_vm2, %v1008_v49  ;;  %v2743_v49 = vld [vmem:[%s3808_s11 + $0x120] ss:$28 sps:$4 sm:$0xff]  }
 0x220   :  { %2539 = vmatprep.mubr.msk.bf16.mxu1 %vm2926_vm1, %v2925_v1  ;;  %2536 = vmatpush3.bf16.msra.mxu1 %v1119_v51  ;;  %v2749_v51 = vld [vmem:[%s3808_s11 + $0xe8] ss:$28 sps:$4 sm:$0xff]  }
 0x221   :  { %2537 = vmatprep.subr.bf16.mxu1 %v2925_v1 }
 0x224   :  { %2538 = vmatpush3.bf16.msra.mxu1 %v2715_v52  ;;  %v2757_v52 = vld [vmem:[%s3808_s11 + $0xb4] ss:$28 sps:$4 sm:$0xff]  }
 0x225   :  { %2012 = vmatprep.subr.bf16.mxu1 %v2730_v9  ;;  %v2811_v9 = vld [vmem:[%s3808_s11 + $0x23c] ss:$28 sps:$4 sm:$0xff]  }
 0x2df   :  { %v1086_v60 = vpop.f32.mrf.mxu1 }
 0x2e0   :  { %v1087_v61 = vadd.f32 %v2340_v59, %v1086_v60  ;;  %v2773_v59 = vld [vmem:[%s3808_s11 + $0x8] ss:$28 sps:$4 sm:$0xff]   ;;  %v2781_v60 = vld [vmem:[%s3808_s11 + $0x354] ss:$28 sps:$4 sm:$0xff]  }
 0x2e1   :  { %v2533_v62 = vpop.f32.mrf.mxu1 }
 0x2e2   :  { %v1092_v63 = vmax.f32 %v1087_v61, 0.0  ;;  %v2779_v61 = vld [vmem:[%s3808_s11 + $0x350] ss:$28 sps:$4 sm:$0xff]   ;;  %v2787_v62 = vld [vmem:[%s3808_s11 + $0x31c] ss:$28 sps:$4 sm:$0xff]  }
 0x2e3   :  { %v1089_v0 = vpop.f32.mrf.mxu1 }
 0x2e4   :  { %v1093_v1 = vpack.c.bf16 %v1092_v63, %v1092_v63  ;;  %v2785_v63 = vld [vmem:[%s3808_s11 + $0x318] ss:$28 sps:$4 sm:$0xff]   ;;  %v2793_v0 = vld [vmem:[%s3808_s11 + $0x2e4] ss:$28 sps:$4 sm:$0xff]  }
 0x2e5   :  { %v2534_v2 = vpop.f32.mrf.mxu1 }
 0x2e6   :  { %2540 = vmatmul.mubr.msk.bf16.vlgmr.msra.gmra.mxu1 %vm1113_vm4, %v1093_v1  ;;  %v2791_v1 = vld [vmem:[%s3808_s11 + $0x2e0] ss:$28 sps:$4 sm:$0xff]   ;;  %v2799_v2 = vld [vmem:[%s3808_s11 + $0x2ac] ss:$28 sps:$4 sm:$0xff]  }
 0x2e7   :  { %2013 = vmatpush1.bf16.msra.mxu1 %v2728_v8  ;;  %v2803_v8 = vld [vmem:[%s3808_s11 + $0x270] ss:$28 sps:$4 sm:$0xff]  }
 0x2e8   :  { %2014 = vmatprep.subr.bf16.mxu1 %v2736_v11  ;;  %v2814_v11 = vld [vmem:[%s3808_s11 + $0x1fc] ss:$28 sps:$4 sm:$0xff]  }
 0x2eb   :  { %2015 = vmatpush1.bf16.msra.mxu1 %v2734_v12  ;;  %v2817_v12 = vld [vmem:[%s3808_s11 + $0x204] ss:$28 sps:$4 sm:$0xff]  }
 0x2ec   :  { %2016 = vmatprep.subr.bf16.mxu1 %v2742_v13  ;;  %v2812_v13 = vld [vmem:[%s3808_s11 + $0x1f8] ss:$28 sps:$4 sm:$0xff]  }
 0x2ef   :  { %2017 = vmatpush1.bf16.msra.mxu1 %v2740_v14  ;;  %v2815_v14 = vld [vmem:[%s3808_s11 + $0x200] ss:$28 sps:$4 sm:$0xff]  }
 0x2f0   :  { %2018 = vmatprep.subr.bf16.mxu1 %v2748_v15  ;;  %v2820_v15 = vld [vmem:[%s3808_s11 + $0x1c4] ss:$28 sps:$4 sm:$0xff]  }
 0x2f3   :  { %2019 = vmatpush1.bf16.msra.mxu1 %v2746_v16  ;;  %v2823_v16 = vld [vmem:[%s3808_s11 + $0x1cc] ss:$28 sps:$4 sm:$0xff]  }
 0x2f4   :  { %2020 = vmatprep.subr.bf16.mxu1 %v2754_v17  ;;  %v2818_v17 = vld [vmem:[%s3808_s11 + $0x1c0] ss:$28 sps:$4 sm:$0xff]  }
 0x2f7   :  { %2021 = vmatpush1.bf16.msra.mxu1 %v2752_v18  ;;  %v2821_v18 = vld [vmem:[%s3808_s11 + $0x1c8] ss:$28 sps:$4 sm:$0xff]  }
 0x2f8   :  { %2022 = vmatprep.subr.bf16.mxu1 %v2760_v19  ;;  %v2826_v19 = vld [vmem:[%s3808_s11 + $0x19c] ss:$28 sps:$4 sm:$0xff]  }
 0x2fb   :  { %2023 = vmatpush1.bf16.msra.mxu1 %v2758_v20  ;;  %v2827_v20 = vld [vmem:[%s3808_s11 + $0x360] ss:$28 sps:$4 sm:$0xff]  }
 0x2fc   :  { %2024 = vmatprep.subr.bf16.mxu1 %v2766_v21  ;;  %v1171_v21 = vld [vmem:[%s3807_s10] sm:$0x3] }
 0x2ff   :  { %2025 = vmatpush1.bf16.msra.mxu1 %v2764_v22  ;;  %v1176_v22 = vrot.slane %v1171_v21, %v3366_v4 }
 0x300   :  { %2026 = vmatprep.subr.bf16.mxu1 %v2772_v23  ;;  %v1180_v23 = vrot.slane %v1171_v21, %v3372_v6  ;;  %v1415_v21 = vsub.s32 3, %v3363_v3 }
 0x303   :  { %2027 = vmatpush1.bf16.msra.mxu1 %v2770_v24 }
 0x304   :  { %2028 = vmatprep.subr.bf16.mxu1 %v2778_v25 }
 0x307   :  { %2029 = vmatpush2.bf16.msra.mxu1 %v2776_v26 }
 0x308   :  { %2030 = vmatprep.subr.bf16.mxu1 %v2784_v27 }
 0x30b   :  { %2031 = vmatpush2.bf16.msra.mxu1 %v2782_v28 }
 0x30c   :  { %2032 = vmatprep.subr.bf16.mxu1 %v2790_v29 }
 0x30f   :  { %2033 = vmatpush2.bf16.msra.mxu1 %v2788_v30 }
 0x310   :  { %2034 = vmatprep.subr.bf16.mxu1 %v2796_v31 }
 0x313   :  { %2035 = vmatpush2.bf16.msra.mxu1 %v2794_v32 }
 0x314   :  { %2036 = vmatprep.subr.bf16.mxu1 %v2802_v33  ;;  %v2824_v33 = vld [vmem:[%s3808_s11 + $0x198] ss:$28 sps:$4 sm:$0xff]  }
 0x317   :  { %2037 = vmatpush2.bf16.msra.mxu1 %v2800_v34  ;;  %v2828_v34 = vld [vmem:[%s3808_s11 + $0x1a0] ss:$28 sps:$4 sm:$0xff]  }
 0x318   :  { %2038 = vmatprep.subr.bf16.mxu1 %v2808_v35 }
 0x31b   :  { %2039 = vmatpush2.bf16.msra.mxu1 %v2806_v36  ;;  %v2831_v36 = vld [vmem:[%s3808_s11 + $0x164] ss:$28 sps:$4 sm:$0xff]  }
 0x31c   :  { %2040 = vmatprep.subr.bf16.mxu1 %v2814_v11  ;;  %v2878_v11 = vld [vmem:[%s3808_s11 + $0x27c] ss:$28 sps:$4 sm:$0xff]  }
 0x31f   :  { %2041 = vmatpush2.bf16.msra.mxu1 %v2812_v13  ;;  %v2881_v13 = vld [vmem:[%s3808_s11 + $0x244] ss:$28 sps:$4 sm:$0xff]  }
 0x320   :  { %2042 = vmatprep.subr.bf16.mxu1 %v2820_v15  ;;  %v2884_v15 = vld [vmem:[%s3808_s11 + $0x20c] ss:$28 sps:$4 sm:$0xff]  }
 0x323   :  { %2043 = vmatpush2.bf16.msra.mxu1 %v2818_v17  ;;  %v2887_v17 = vld [vmem:[%s3808_s11 + $0x1d4] ss:$28 sps:$4 sm:$0xff]  }
 0x324   :  { %2094 = vmatprep.subr.bf16.mxu1 %v2826_v19  ;;  %v1411_v19 = vsub.s32 2, %v3363_v3 }
 0x3a6   :  { %v1155_v38 = vpop.f32.mrf.mxu1 }
 0x3a7   :  { %v1156_v39 = vadd.f32 %v2346_v37, %v1155_v38  ;;  %v2832_v37 = vld [vmem:[%s3808_s11 + $0x328] ss:$28 sps:$4 sm:$0xff]   ;;  %v2829_v38 = vld [vmem:[%s3808_s11 + $0x160] ss:$28 sps:$4 sm:$0xff]  }
 0x3a8   :  { %v2541_v40 = vpop.f32.mrf.mxu1 }
 0x3a9   :  { %v1161_v41 = vmax.f32 %v1156_v39, 0.0  ;;  %v2833_v39 = vld [vmem:[%s3808_s11 + $0x168] ss:$28 sps:$4 sm:$0xff]  }
 0x3aa   :  { %v1158_v42 = vpop.f32.mrf.mxu1  ;;  %v2836_v40 = vld [vmem:[%s3808_s11 + $0x12c] ss:$28 sps:$4 sm:$0xff]  }
 0x3ab   :  { %v1162_v44 = vpack.c.bf16 %v1161_v41, %v1161_v41  ;;  %v2837_v41 = vld [vmem:[%s3808_s11 + $0x2f0] ss:$28 sps:$4 sm:$0xff]   ;;  %v2834_v42 = vld [vmem:[%s3808_s11 + $0x128] ss:$28 sps:$4 sm:$0xff]  }
 0x3ac   :  { %v2542_v46 = vpop.f32.mrf.mxu1 }
 0x3ad   :  { %2358 = vmatmul.mubr.msk.bf16.vlgmr.msra.gmra.mxu0 %vm1048_vm2, %v1162_v44  ;;  %v2841_v44 = vld [vmem:[%s3808_s11 + $0xf4] ss:$28 sps:$4 sm:$0xff]  }
 0x3ae   :  { %2054 = vmatpush1.bf16.msra.mxu0 %v2731_v43  ;;  %v2838_v43 = vld [vmem:[%s3808_s11 + $0x130] ss:$28 sps:$4 sm:$0xff]  }
 0x3af   :  { %2055 = vmatprep.subr.bf16.mxu0 %v2739_v45  ;;  %v2842_v45 = vld [vmem:[%s3808_s11 + $0x2b8] ss:$28 sps:$4 sm:$0xff]   ;;  %v2839_v46 = vld [vmem:[%s3808_s11 + $0xf0] ss:$28 sps:$4 sm:$0xff]  }
 0x3b2   :  { %2056 = vmatpush1.bf16.msra.mxu0 %v2737_v47  ;;  %v2843_v47 = vld [vmem:[%s3808_s11 + $0xf8] ss:$28 sps:$4 sm:$0xff]  }
 0x3b3   :  { %2057 = vmatprep.subr.bf16.mxu0 %v2745_v48  ;;  %v2846_v48 = vld [vmem:[%s3808_s11 + $0xbc] ss:$28 sps:$4 sm:$0xff]  }
 0x3b6   :  { %2058 = vmatpush1.bf16.msra.mxu0 %v2743_v49  ;;  %v2847_v49 = vld [vmem:[%s3808_s11 + $0x280] ss:$28 sps:$4 sm:$0xff]  }
 0x3b7   :  { %2059 = vmatprep.subr.bf16.mxu0 %v2751_v50  ;;  %v2844_v50 = vld [vmem:[%s3808_s11 + $0xb8] ss:$28 sps:$4 sm:$0xff]  }
 0x3ba   :  { %2060 = vmatpush1.bf16.msra.mxu0 %v2749_v51  ;;  %v2848_v51 = vld [vmem:[%s3808_s11 + $0xc0] ss:$28 sps:$4 sm:$0xff]  }
 0x3bb   :  { %2061 = vmatprep.subr.bf16.mxu0 %v2757_v52  ;;  %v2851_v52 = vld [vmem:[%s3808_s11 + $0x84] ss:$28 sps:$4 sm:$0xff]  }
 0x3be   :  { %2062 = vmatpush1.bf16.msra.mxu0 %v2755_v53  ;;  %v2852_v53 = vld [vmem:[%s3808_s11 + $0x248] ss:$28 sps:$4 sm:$0xff]  }
 0x3bf   :  { %2063 = vmatprep.subr.bf16.mxu0 %v2763_v54  ;;  %v2849_v54 = vld [vmem:[%s3808_s11 + $0x80] ss:$28 sps:$4 sm:$0xff]  }
 0x3c2   :  { %2064 = vmatpush1.bf16.msra.mxu0 %v2761_v55  ;;  %v2853_v55 = vld [vmem:[%s3808_s11 + $0x88] ss:$28 sps:$4 sm:$0xff]  }
 0x3c3   :  { %2065 = vmatprep.subr.bf16.mxu0 %v2769_v56  ;;  %v2856_v56 = vld [vmem:[%s3808_s11 + $0x4c] ss:$28 sps:$4 sm:$0xff]  }
 0x3c6   :  { %2066 = vmatpush1.bf16.msra.mxu0 %v2767_v57  ;;  %v2857_v57 = vld [vmem:[%s3808_s11 + $0x210] ss:$28 sps:$4 sm:$0xff]  }
 0x3c7   :  { %2067 = vmatprep.subr.bf16.mxu0 %v2775_v58  ;;  %v2854_v58 = vld [vmem:[%s3808_s11 + $0x48] ss:$28 sps:$4 sm:$0xff]  }
 0x3ca   :  { %2068 = vmatpush1.bf16.msra.mxu0 %v2773_v59  ;;  %v2858_v59 = vld [vmem:[%s3808_s11 + $0x50] ss:$28 sps:$4 sm:$0xff]  }
 0x3cb   :  { %2069 = vmatprep.subr.bf16.mxu0 %v2781_v60  ;;  %v2861_v60 = vld [vmem:[%s3808_s11 + $0x14] ss:$28 sps:$4 sm:$0xff]  }
 0x3ce   :  { %2070 = vmatpush2.bf16.msra.mxu0 %v2779_v61  ;;  %v2862_v61 = vld [vmem:[%s3808_s11 + $0x1d8] ss:$28 sps:$4 sm:$0xff]  }
 0x3cf   :  { %2071 = vmatprep.subr.bf16.mxu0 %v2787_v62  ;;  %v2859_v62 = vld [vmem:[%s3808_s11 + $0x10] ss:$28 sps:$4 sm:$0xff]  }
 0x3d2   :  { %2072 = vmatpush2.bf16.msra.mxu0 %v2785_v63  ;;  %v2863_v63 = vld [vmem:[%s3808_s11 + $0x18] ss:$28 sps:$4 sm:$0xff]  }
 0x3d3   :  { %2073 = vmatprep.subr.bf16.mxu0 %v2793_v0  ;;  %v2866_v0 = vld [vmem:[%s3808_s11 + $0x35c] ss:$28 sps:$4 sm:$0xff]  }
 0x3d6   :  { %2074 = vmatpush2.bf16.msra.mxu0 %v2791_v1  ;;  %v2864_v1 = vld [vmem:[%s3808_s11 + $0x358] ss:$28 sps:$4 sm:$0xff]  }
 0x3d7   :  { %2075 = vmatprep.subr.bf16.mxu0 %v2799_v2  ;;  %v2869_v2 = vld [vmem:[%s3808_s11 + $0x324] ss:$28 sps:$4 sm:$0xff]  }
 0x3da   :  { %2076 = vmatpush2.bf16.msra.mxu0 %v2797_v5  ;;  %v2867_v5 = vld [vmem:[%s3808_s11 + $0x320] ss:$28 sps:$4 sm:$0xff]  }
 0x3db   :  { %2077 = vmatprep.subr.bf16.mxu0 %v2805_v7  ;;  %v2872_v7 = vld [vmem:[%s3808_s11 + $0x2ec] ss:$28 sps:$4 sm:$0xff]  }
 0x3de   :  { %2078 = vmatpush2.bf16.msra.mxu0 %v2803_v8  ;;  %v2870_v8 = vld [vmem:[%s3808_s11 + $0x2e8] ss:$28 sps:$4 sm:$0xff]  }
 0x3df   :  { %2079 = vmatprep.subr.bf16.mxu0 %v2811_v9  ;;  %v2875_v9 = vld [vmem:[%s3808_s11 + $0x2b4] ss:$28 sps:$4 sm:$0xff]  }
 0x3e2   :  { %2080 = vmatpush2.bf16.msra.mxu0 %v2809_v10  ;;  %v2873_v10 = vld [vmem:[%s3808_s11 + $0x2b0] ss:$28 sps:$4 sm:$0xff]  }
 0x3e3   :  { %2081 = vmatprep.subr.bf16.mxu0 %v2817_v12  ;;  %v2876_v12 = vld [vmem:[%s3808_s11 + $0x278] ss:$28 sps:$4 sm:$0xff]  }
 0x3e6   :  { %2082 = vmatpush2.bf16.msra.mxu0 %v2815_v14  ;;  %v2879_v14 = vld [vmem:[%s3808_s11 + $0x240] ss:$28 sps:$4 sm:$0xff]  }
 0x3e7   :  { %2083 = vmatprep.subr.bf16.mxu0 %v2823_v16  ;;  %v2882_v16 = vld [vmem:[%s3808_s11 + $0x208] ss:$28 sps:$4 sm:$0xff]  }
 0x3ea   :  { %2084 = vmatpush2.bf16.msra.mxu0 %v2821_v18  ;;  %v2885_v18 = vld [vmem:[%s3808_s11 + $0x1d0] ss:$28 sps:$4 sm:$0xff]   ;;  %s2927_s11 = smov [#allocation2]  }
 0x3eb   :  { %2501 = vmatprep.subr.bf16.mxu0 %v2827_v20  ;;  %v1399_v20 = vld [vmem:[%s3809_s12] sm:$0x7f]  ;;  %s2216_s12 = sshll.u32 %s2927_s11, 4  ;;  %s2217_s12 = int_to_ptr.vmem [resolvable:$true] %s2216_s12 }
 0x3ec   :  { %s2902_s22 = scalar_lea.vmem %s2217_s12, 896  ;;  %p2907_p1 = scmp.lt.s32.totalorder %s2217_s12, %s2217_s12 }
 0x3ed   :  { %p2903_p0 = scmp.ne.s32.totalorder %s2217_s12, %s2902_s22  ;;  %p2908_p2 = scmp.lt.s32.totalorder %s2902_s22, %s2902_s22 }
 0x3ef   :  { %p2909_p3 = por %p2908_p2, %p2907_p1 }
 0x3f1   :  { %p2910_p4 = pnand %p2909_p3, %p2903_p0 }
 0x46d   :  { %v1260_v24 = vpop.f32.mrf.mxu0 }
 0x46e   :  { %v1261_v25 = vadd.f32 %v1260_v24, %v1176_v22  ;;  %v1404_v22 = vrot.slane %v1399_v20, %v3366_v4  ;;  %v1408_v24 = vrot.slane %v1399_v20, %v3372_v6 }
 0x46f   :  { %v1262_v26 = vpop.f32.mrf.mxu0 }
 0x470   :  { %v1263_v27 = vadd.f32 %v1262_v26, %v1180_v23  ;;  %v1267_v28 = vmax.f32 %v1261_v25, 0.0  ;;  %v1412_v23 = vrot.slane %v1399_v20, %v1411_v19  ;;  %v1416_v25 = vrot.slane %v1399_v20, %v1415_v21 }
 0x471   :  { %v1264_v29 = vpop.f32.mrf.mxu0 }
 0x472   :  { %v1268_v30 = vmax.f32 %v1263_v27, 0.0  ;;  %v3645_v35 = vpack.c.bf16 %v1267_v28, %v1267_v28 }
 0x473   :  { %v1265_v31 = vpop.f32.mrf.mxu0 }
 0x474   :  { %v1270_v32 = vpack.c.bf16 %v1268_v30, %v1268_v30 }
 0x476   :  { %2044 = vmatprep.mubr.bf16.mxu1 %v1270_v32  ;;  %2085 = vmatprep.mubr.bf16.mxu0 %v1270_v32 }
 0x477   :  { %2045 = vmatmul.mubr.bf16.vlgmr.msra.gmra.mxu1 %v3645_v35  ;;  %2086 = vmatmul.mubr.bf16.vlgmr.msra.gmra.mxu0 %v3645_v35 }
 0x478   :  { %2095 = vmatpush1.bf16.msra.mxu1 %v2824_v33  ;;  %2502 = vmatpush3.bf16.msra.mxu0 %v2828_v34 }
 0x479   :  { %2126 = vmatprep.mubr.bf16.mxu1 %v1270_v32  ;;  %2167 = vmatprep.mubr.bf16.mxu0 %v1270_v32 }
 0x47a   :  { %2096 = vmatprep.subr.bf16.mxu1 %v2831_v36  ;;  %2503 = vmatprep.subr.bf16.mxu0 %v2832_v37 }
 0x47c   :  { %2097 = vmatpush1.bf16.msra.mxu1 %v2829_v38  ;;  %2504 = vmatpush3.bf16.msra.mxu0 %v2833_v39 }
 0x47d   :  { %2098 = vmatprep.subr.bf16.mxu1 %v2836_v40  ;;  %2505 = vmatprep.subr.bf16.mxu0 %v2837_v41 }
 0x480   :  { %2099 = vmatpush1.bf16.msra.mxu1 %v2834_v42  ;;  %2506 = vmatpush3.bf16.msra.mxu0 %v2838_v43 }
 0x481   :  { %2100 = vmatprep.subr.bf16.mxu1 %v2841_v44  ;;  %2507 = vmatprep.subr.bf16.mxu0 %v2842_v45 }
 0x484   :  { %2101 = vmatpush1.bf16.msra.mxu1 %v2839_v46  ;;  %2508 = vmatpush3.bf16.msra.mxu0 %v2843_v47 }
 0x485   :  { %2102 = vmatprep.subr.bf16.mxu1 %v2846_v48  ;;  %2509 = vmatprep.subr.bf16.mxu0 %v2847_v49 }
 0x488   :  { %2103 = vmatpush1.bf16.msra.mxu1 %v2844_v50  ;;  %2510 = vmatpush3.bf16.msra.mxu0 %v2848_v51 }
 0x489   :  { %2104 = vmatprep.subr.bf16.mxu1 %v2851_v52  ;;  %2511 = vmatprep.subr.bf16.mxu0 %v2852_v53  ;;  %v1427_v52 = vsub.s32 6, %v3363_v3 }
 0x48c   :  { %2105 = vmatpush1.bf16.msra.mxu1 %v2849_v54  ;;  %2512 = vmatpush3.bf16.msra.mxu0 %v2853_v55  ;;  %v1428_v54 = vrot.slane %v1399_v20, %v1427_v52 }
 0x48d   :  { %2106 = vmatprep.subr.bf16.mxu1 %v2856_v56  ;;  %2513 = vmatprep.subr.bf16.mxu0 %v2857_v57 }
 0x490   :  { %2107 = vmatpush1.bf16.msra.mxu1 %v2854_v58  ;;  %2514 = vmatpush3.bf16.msra.mxu0 %v2858_v59 }
 0x491   :  { %2108 = vmatprep.subr.bf16.mxu1 %v2861_v60  ;;  %2515 = vmatprep.subr.bf16.mxu0 %v2862_v61 }
 0x494   :  { %2109 = vmatpush1.bf16.msra.mxu1 %v2859_v62  ;;  %2516 = vmatpush3.bf16.msra.mxu0 %v2863_v63 }
 0x495   :  { %2110 = vmatprep.subr.bf16.mxu1 %v2866_v0  ;;  %v1419_v0 = vsub.s32 4, %v3363_v3 }
 0x497   :  { %2168 = vmatmul.mubr.bf16.vlgmr.msra.gmra.mxu0 %v3645_v35 }
 0x498   :  { %2111 = vmatpush2.bf16.msra.mxu1 %v2864_v1  ;;  %v1423_v1 = vsub.s32 5, %v3363_v3 }
 0x499   :  { %2112 = vmatprep.subr.bf16.mxu1 %v2869_v2  ;;  %v1420_v2 = vrot.slane %v1399_v20, %v1419_v0 }
 0x49c   :  { %2113 = vmatpush2.bf16.msra.mxu1 %v2867_v5  ;;  %v1424_v5 = vrot.slane %v1399_v20, %v1423_v1 }
 0x49d   :  { %2114 = vmatprep.subr.bf16.mxu1 %v2872_v7 }
 0x4a0   :  { %2115 = vmatpush2.bf16.msra.mxu1 %v2870_v8 }
 0x4a1   :  { %2116 = vmatprep.subr.bf16.mxu1 %v2875_v9 }
 0x4a4   :  { %2117 = vmatpush2.bf16.msra.mxu1 %v2873_v10 }
 0x4a5   :  { %2118 = vmatprep.subr.bf16.mxu1 %v2878_v11 }
 0x4a8   :  { %2119 = vmatpush2.bf16.msra.mxu1 %v2876_v12 }
 0x4a9   :  { %2120 = vmatprep.subr.bf16.mxu1 %v2881_v13 }
 0x4ac   :  { %2121 = vmatpush2.bf16.msra.mxu1 %v2879_v14 }
 0x4ad   :  { %2122 = vmatprep.subr.bf16.mxu1 %v2884_v15 }
 0x4b0   :  { %2123 = vmatpush2.bf16.msra.mxu1 %v2882_v16 }
 0x4b1   :  { %2124 = vmatprep.subr.bf16.mxu1 %v2887_v17 }
 0x4b4   :  { %2125 = vmatpush2.bf16.msra.mxu1 %v2885_v18 }
 0x4b7   :  { %2127 = vmatmul.mubr.bf16.vlgmr.msra.gmra.mxu1 %v3645_v35 }
 0x537   :  { %v2046_v26 = vpop.f32.mrf.mxu1  ;;  %v2087_v27 = vpop.f32.mrf.mxu0 }
 0x538   :  { %v2047_v28 = vadd.f32 %v2046_v26, %v1404_v22  ;;  %v2088_v29 = vadd.f32 %v2087_v27, %v1412_v23 }
 0x539   :  { %v2048_v30 = vpop.f32.mrf.mxu1  ;;  %v2089_v31 = vpop.f32.mrf.mxu0 }
 0x53a   :  { %v2175_v32 = vmul.f32 0.5, %v2047_v28  ;;  %v2177_v33 = vmul.f32 0.5, %v2088_v29  ;;  %v2049_v34 = vadd.f32 %v2048_v30, %v1408_v24  ;;  %v2090_v35 = vadd.f32 %v2089_v31, %v1416_v25 }
 0x53b   :  { %v2050_v36 = vpop.f32.mrf.mxu1  ;;  %v2091_v37 = vpop.f32.mrf.mxu0 }
 0x53c   :  { %2888 = vtanh.f32 %v2175_v32  ;;  %v2176_v38 = vmul.f32 0.5, %v2049_v34  ;;  %v2178_v39 = vmul.f32 0.5, %v2090_v35 }
 0x53d   :  { %2890 = vtanh.f32 %v2177_v33  ;;  %v2051_v4 = vpop.f32.mrf.mxu1  ;;  %v2092_v40 = vpop.f32.mrf.mxu0 }
 0x53e   :  { %2892 = vtanh.f32 %v2176_v38 }
 0x53f   :  { %2894 = vtanh.f32 %v2178_v39 }
 0x549   :  { %v2889_v6 = vpop.eup %2888 }
 0x54a   :  { %v2891_v41 = vpop.eup %2890  ;;  %v2189_v42 = vmul.f32 0.5, %v2889_v6 }
 0x54b   :  { %v2893_v43 = vpop.eup %2892  ;;  %v2191_v44 = vmul.f32 0.5, %v2891_v41 }
 0x54c   :  { %v2895_v45 = vpop.eup %2894  ;;  %v2196_v46 = vadd.f32 0.5, %v2189_v42  ;;  %v2190_v47 = vmul.f32 0.5, %v2893_v43 }
 0x54d   :  { %v2198_v48 = vadd.f32 0.5, %v2191_v44  ;;  %v2192_v49 = vmul.f32 0.5, %v2895_v45 }
 0x54e   :  { %2203 = vst [vmem:[#allocation2] sm:$0xff] %v2196_v46  ;;  %v2197_v50 = vadd.f32 0.5, %v2190_v47 }
 0x54f   :  { %2205 = vst [vmem:[#allocation2 + $0x10] sm:$0xff] %v2198_v48  ;;  %v2199_v51 = vadd.f32 0.5, %v2192_v49 }
 0x550   :  { %2204 = vst [vmem:[#allocation2 + $0x8] sm:$0xff] %v2197_v50 }
 0x551   :  { %2206 = vst [vmem:[#allocation2 + $0x18] sm:$0xff] %v2199_v51 }
 0x557   :  { %v2517_v53 = vpop.f32.mrf.mxu0 }
 0x559   :  { %v2518_v55 = vpop.f32.mrf.mxu0 }
 0x55a   :  { %v2519_v56 = vadd.f32 %v2518_v55, %v2517_v53 }
 0x55b   :  { %v2520_v57 = vpop.f32.mrf.mxu0 }
 0x55c   :  { %v2170_v58 = vadd.f32 %v2519_v56, %v1428_v54 }
 0x55d   :  { %v2521_v59 = vpop.f32.mrf.mxu0 }
 0x55e   :  { %v2181_v60 = vmul.f32 0.5, %v2170_v58 }
 0x560   :  { %2896 = vtanh.f32 %v2181_v60 }
 0x56d   :  { %v2897_v61 = vpop.eup %2896 }
 0x56e   :  { %v2195_v62 = vmul.f32 0.5, %v2897_v61 }
 0x570   :  { %v2202_v63 = vadd.f32 0.5, %v2195_v62 }
 0x572   :  { %2209 = vst.msk [vmem:[#allocation2 + $0x30] sm:$0xff] %vm660_vm0, %v2202_v63 }
 0x577   :  { %v2128_v7 = vpop.f32.mrf.mxu1 }
 0x578   :  { %v2129_v8 = vadd.f32 %v2128_v7, %v1420_v2 }
 0x579   :  { %v2130_v9 = vpop.f32.mrf.mxu1 }
 0x57a   :  { %v2179_v10 = vmul.f32 0.5, %v2129_v8  ;;  %v2131_v11 = vadd.f32 %v2130_v9, %v1424_v5 }
 0x57b   :  { %v2132_v12 = vpop.f32.mrf.mxu1 }
 0x57c   :  { %2898 = vtanh.f32 %v2179_v10  ;;  %v2180_v13 = vmul.f32 0.5, %v2131_v11 }
 0x57d   :  { %v2133_v14 = vpop.f32.mrf.mxu1 }
 0x57e   :  { %2900 = vtanh.f32 %v2180_v13 }
 0x589   :  { %v2899_v15 = vpop.eup %2898 }
 0x58a   :  { %v2193_v16 = vmul.f32 0.5, %v2899_v15 }
 0x58b   :  { %v2901_v17 = vpop.eup %2900 }
 0x58c   :  { %v2200_v18 = vadd.f32 0.5, %v2193_v16  ;;  %v2194_v19 = vmul.f32 0.5, %v2901_v17 }
 0x58e   :  { %2207 = vst [vmem:[#allocation2 + $0x20] sm:$0xff] %v2200_v18  ;;  %v2201_v3 = vadd.f32 0.5, %v2194_v19 }
 0x590   :  { %2208 = vst [vmem:[#allocation2 + $0x28] sm:$0xff] %v2201_v3 }
 0x591   :  { %2913 = shalt.err (!%p2910_p4)
}
 0x592   :  { %2219 = dma.vmem_to_hbm [thread:$0]  %s2217_s12, 896, %s3810_s13, [#allocation3]  }
 0x593   :  { %2922 = dma.done.wait [#allocation3], 896  }
 0x594   :  { %2923 = vsyncadd [#allocation3], 4294966400 }
 0x595   :  { %2223 = vsyncpa [#allocation3], 1 }

</bundles_post_ra>
